<compile_context>
chip_gen: v7x
topology: tpu7x:2x2x1
jax: 0.10.0
libtpu: 0.0.40
codegen_flags: <defaults>
</compile_context>

<pallas_src>
import jax
import jax.numpy as jnp
from jax import lax
from jax.experimental import pallas as pl
from jax.experimental.pallas import tpu as pltpu

N_HIDDEN = 5     # matches `n_hidden = 5` in the torch module
LANE = 128       # one vreg lane-width per gate slab (lane-aligned gate layout)


def bilstm_attention_kernel(x_ref, wihf_ref, wihb_ref, bf_ref, bb_ref,
                            whh_ref, qf_ref, qb_ref, c0_ref,
                            woutf_ref, woutb_ref, bout_ref,
                            logits_ref, pred_ref,
                            xpf_ref, xpb_ref):
    """Fused bidirectional LSTM + attention + output linear + argmax.

    Lane layout (per 128-lane gate slab, slab order i | f | o | g):
      lanes 0:H  -> forward direction, lanes H:2H -> backward, rest zero padding.
    x_ref        : (S*B, E)      time-major input, (time, batch) collapsed
    wihf/wihb    : (E, 4*LANE)   input->gate weights (fwd / bwd lanes only)
    bf/bb        : (1, 4*LANE)   combined LSTM biases (fwd / bwd lanes only)
    whh          : (2H, 4*LANE)  hidden->gate weights, block structure
    qf/qb        : (B, LANE)     initial hidden state (fwd/bwd lanes) = attn query
    c0           : (B, LANE)     initial cell state, both directions packed
    woutf/woutb  : (LANE, C)     output linear weights (live rows 0:H / H:2H)
    bout         : (1, C)
    logits_ref   : (B, C) f32 out; pred_ref: (B, 1) i32 out
    xpf/xpb      : (S*B, 4*LANE) VMEM scratch holding the hoisted projections
    """
    B = qf_ref.shape[0]
    L = qf_ref.shape[1]
    S = x_ref.shape[0] // B
    H = N_HIDDEN

    # ---- hoisted input projection: ONE matmul per direction for the whole
    #      sequence (biases folded in); nothing here sits on the serial chain.
    x = x_ref[...]                                               # (S*B, E)
    xpf_ref[...] = (jnp.dot(x, wihf_ref[...],
                            preferred_element_type=jnp.float32) + bf_ref[...])
    xpb_ref[...] = (jnp.dot(x, wihb_ref[...],
                            preferred_element_type=jnp.float32) + bb_ref[...])

    whh = whh_ref[...]                                           # (2H, 4L)
    h = qf_ref[...] + qb_ref[...]                                # (B, L) fwd|bwd packed
    c = c0_ref[...]                                              # (B, L)

    # ---- fused fwd+bwd recurrence: ONE dot, ONE sigmoid slab, ONE tanh per
    #      step. Step i advances the forward chain at time i and the backward
    #      chain at time S-1-i inside the same lane-packed carry.
    hs = []
    for i in range(S):
        pre = (xpf_ref[pl.ds(i * B, B), :]                       # fwd preact, time i
               + xpb_ref[pl.ds((S - 1 - i) * B, B), :]           # bwd preact, time S-1-i
               + jnp.dot(h[:, :2 * H], whh,
                         preferred_element_type=jnp.float32))    # (B, 4L)
        ifo = jax.nn.sigmoid(pre[:, :3 * L])                     # one slab: i, f, o
        g = jnp.tanh(pre[:, 3 * L:])                             # (B, L)
        i_g = ifo[:, 0 * L:1 * L]
        f_g = ifo[:, 1 * L:2 * L]
        o_g = ifo[:, 2 * L:3 * L]
        c = f_g * c + i_g * g                                    # lane-aligned, no rotates
        h = o_g * jnp.tanh(c)
        hs.append(h)                                             # history in registers

    # ---- attention (this module's forward attends with the *initial* hidden
    #      state).  hs[t] holds h_fwd[time t] in lanes 0:H and h_bwd[time S-1-t]
    #      in lanes H:2H; qf/qb are zero outside their own lanes, so the two
    #      inner products separate cleanly without lane-offset slices.
    qf = qf_ref[...]
    qb = qb_ref[...]
    sf = [jnp.sum(hs[t] * qf, axis=1, keepdims=True) for t in range(S)]
    sb = [jnp.sum(hs[t] * qb, axis=1, keepdims=True) for t in range(S)]
    scores = [sf[t] + sb[S - 1 - t] for t in range(S)]           # (B, 1) per time t

    m = scores[0]
    for t in range(1, S):
        m = jnp.maximum(m, scores[t])
    es = [jnp.exp(s - m) for s in scores]
    denom = es[0]
    for t in range(1, S):
        denom = denom + es[t]
    inv = pl.reciprocal(denom, approx=False)                     # softmax denom
    soft = [e * inv for e in es]                                 # (B, 1) per time t

    # contexts (lane-packed): fwd context from hs[t], bwd context from hs[S-1-t]
    ctx_f = soft[0] * hs[0]
    ctx_b = soft[0] * hs[S - 1]
    for t in range(1, S):
        ctx_f = ctx_f + soft[t] * hs[t]
        ctx_b = ctx_b + soft[t] * hs[S - 1 - t]

    # ---- output linear: dead padding lanes hit all-zero weight rows
    logits = (jnp.dot(ctx_f, woutf_ref[...], preferred_element_type=jnp.float32)
              + jnp.dot(ctx_b, woutb_ref[...], preferred_element_type=jnp.float32)
              + bout_ref[...])                                   # (B, C)
    logits_ref[...] = logits

    # ---- argmax over classes (first maximal index)
    num_classes = logits.shape[1]
    maxv = jnp.max(logits, axis=1, keepdims=True)
    idx = lax.broadcasted_iota(jnp.int32, logits.shape, 1)
    cand = jnp.where(logits == maxv, idx, jnp.int32(num_classes))
    pred_ref[...] = jnp.min(cand, axis=1, keepdims=True)


def pack_params(params):
    """Eager, call-invariant repacking of PyTorch-layout parameters into the
    lane-aligned, direction-fused layouts the kernel consumes.  Run once,
    outside the jitted per-call path.

    Each gate gets its own LANE-wide slab (slab order i | f | o | g so the
    sigmoid gates form one contiguous group); within every slab lanes 0:H carry
    the forward direction and lanes H:2H the backward direction."""
    H = N_HIDDEN
    L = LANE
    E = params["w_ih_f"].shape[1]
    C = params["w_out"].shape[0]
    # PyTorch gate row order is (i, f, g, o); kernel slab order is (i, f, o, g).
    slab_to_torch = (0, 1, 3, 2)

    def pack_input(w_ih, lane_off):
        w = w_ih.reshape(4, H, E)
        out = jnp.zeros((E, 4 * L), jnp.float32)
        for slab, tg in enumerate(slab_to_torch):
            col = slab * L + lane_off
            out = out.at[:, col:col + H].set(w[tg].T)
        return out

    def pack_bias(b_ih, b_hh, lane_off):
        b = (b_ih + b_hh).reshape(4, H)
        out = jnp.zeros((1, 4 * L), jnp.float32)
        for slab, tg in enumerate(slab_to_torch):
            col = slab * L + lane_off
            out = out.at[0, col:col + H].set(b[tg])
        return out

    def pack_hidden(w_hh, row_off, lane_off):
        w = w_hh.reshape(4, H, H)
        out = jnp.zeros((2 * H, 4 * L), jnp.float32)
        for slab, tg in enumerate(slab_to_torch):
            col = slab * L + lane_off
            out = out.at[row_off:row_off + H, col:col + H].set(w[tg].T)
        return out

    w_out_t = params["w_out"].T                                  # (2H, C)
    return {
        "wih_f": pack_input(params["w_ih_f"], 0),
        "wih_b": pack_input(params["w_ih_b"], H),
        "b_f": pack_bias(params["b_ih_f"], params["b_hh_f"], 0),
        "b_b": pack_bias(params["b_ih_b"], params["b_hh_b"], H),
        "whh": (pack_hidden(params["w_hh_f"], 0, 0)
                + pack_hidden(params["w_hh_b"], H, H)),
        "w_out_f": jnp.zeros((L, C), jnp.float32).at[:H, :].set(w_out_t[:H]),
        "w_out_b": jnp.zeros((L, C), jnp.float32).at[H:2 * H, :].set(w_out_t[H:2 * H]),
        "b_out": params["b_out"].reshape(1, C),
    }


def bilstm_attention_forward(x, packed, h0, c0):
    """x: (B, S, E) f32; packed: output of pack_params; h0/c0: (2, B, H) f32
    (the torch.randn initial states). Returns (logits (B, C) f32, preds (B,) i32)."""
    batch, seq_len, emb = x.shape
    H = N_HIDDEN
    L = LANE
    num_classes = packed["w_out_f"].shape[1]

    # time-major like X.transpose(0, 1); leading-dim collapse is layout-free
    x2d = jnp.transpose(x, (1, 0, 2)).reshape(seq_len * batch, emb)

    # lane-pack the per-call initial states (fwd -> lanes 0:H, bwd -> lanes H:2H)
    qf = jnp.zeros((batch, L), jnp.float32).at[:, :H].set(h0[0])
    qb = jnp.zeros((batch, L), jnp.float32).at[:, H:2 * H].set(h0[1])
    c0p = (jnp.zeros((batch, L), jnp.float32)
           .at[:, :H].set(c0[0]).at[:, H:2 * H].set(c0[1]))

    vmem = pl.BlockSpec(memory_space=pltpu.MemorySpace.VMEM)
    logits, pred = pl.pallas_call(
        bilstm_attention_kernel,
        out_shape=(jax.ShapeDtypeStruct((batch, num_classes), jnp.float32),
                   jax.ShapeDtypeStruct((batch, 1), jnp.int32)),
        in_specs=[vmem] * 12,
        out_specs=(vmem, vmem),
        scratch_shapes=[pltpu.VMEM((seq_len * batch, 4 * L), jnp.float32),
                        pltpu.VMEM((seq_len * batch, 4 * L), jnp.float32)],
    )(x2d, packed["wih_f"], packed["wih_b"], packed["b_f"], packed["b_b"],
      packed["whh"], qf, qb, c0p,
      packed["w_out_f"], packed["w_out_b"], packed["b_out"])
    return logits, pred[:, 0]


def init_params(key, embedding_dim, num_classes):
    """Deterministic init matching the module's parameter shapes (PyTorch layout)."""
    H = N_HIDDEN
    k_lstm = 1.0 / (H ** 0.5)
    k_out = 1.0 / ((2 * H) ** 0.5)
    keys = jax.random.split(key, 10)
    u = lambda kk, shape, b: jax.random.uniform(kk, shape, jnp.float32, -b, b)
    return {
        # nn.LSTM(embedding_dim, n_hidden, bidirectional=True), gate order i,f,g,o
        "w_ih_f": u(keys[0], (4 * H, embedding_dim), k_lstm),
        "w_hh_f": u(keys[1], (4 * H, H), k_lstm),
        "b_ih_f": u(keys[2], (4 * H,), k_lstm),
        "b_hh_f": u(keys[3], (4 * H,), k_lstm),
        "w_ih_b": u(keys[4], (4 * H, embedding_dim), k_lstm),
        "w_hh_b": u(keys[5], (4 * H, H), k_lstm),
        "b_ih_b": u(keys[6], (4 * H,), k_lstm),
        "b_hh_b": u(keys[7], (4 * H,), k_lstm),
        # nn.Linear(n_hidden * 2, num_classes)
        "w_out": u(keys[8], (num_classes, 2 * H), k_out),
        "b_out": u(keys[9], (num_classes,), k_out),
    }


def reference_forward(x, params, h0, c0):
    """Pure-JAX reference with the exact torch semantics (for validation)."""
    H = N_HIDDEN
    B, S, E = x.shape

    def cell(x_t, h, c, w_ih, w_hh, b_ih, b_hh):
        gates = x_t @ w_ih.T + b_ih + h @ w_hh.T + b_hh
        i, f, g, o = jnp.split(gates, 4, axis=1)       # torch gate order i,f,g,o
        i, f, o = jax.nn.sigmoid(i), jax.nn.sigmoid(f), jax.nn.sigmoid(o)
        g = jnp.tanh(g)
        c = f * c + i * g
        return o * jnp.tanh(c), c

    xs = jnp.transpose(x, (1, 0, 2))                    # (S, B, E)
    hf, cf = h0[0], c0[0]
    hb, cb = h0[1], c0[1]
    fwd, bwd = [], [None] * S
    for t in range(S):
        hf, cf = cell(xs[t], hf, cf, params["w_ih_f"], params["w_hh_f"],
                      params["b_ih_f"], params["b_hh_f"])
        fwd.append(hf)
    for t in range(S - 1, -1, -1):
        hb, cb = cell(xs[t], hb, cb, params["w_ih_b"], params["w_hh_b"],
                      params["b_ih_b"], params["b_hh_b"])
        bwd[t] = hb
    out = jnp.stack([jnp.concatenate([fwd[t], bwd[t]], axis=1)
                     for t in range(S)], axis=1)        # (B, S, 2H)
    query = jnp.concatenate([h0[0], h0[1]], axis=1)     # initial hidden state
    attn = jnp.einsum('bsk,bk->bs', out, query)
    soft = jax.nn.softmax(attn, axis=1)
    ctx = jnp.einsum('bsk,bs->bk', out, soft)
    logits = ctx @ params["w_out"].T + params["b_out"]
    return logits, jnp.argmax(logits, axis=1)


if __name__ == "__main__":
    key = jax.random.PRNGKey(0)
    batch, seq_len, embedding_dim, num_classes = 2, 8, 16, 4

    kx, kh, kc, kp = jax.random.split(key, 4)
    x = jax.random.normal(kx, (batch, seq_len, embedding_dim), jnp.float32)
    # torch.randn initial states in forward(); generated deterministically here.
    h0 = jax.random.normal(kh, (2, batch, N_HIDDEN), jnp.float32)
    c0 = jax.random.normal(kc, (2, batch, N_HIDDEN), jnp.float32)
    params = init_params(kp, embedding_dim, num_classes)

    # Call-invariant repacking, deliberately outside the jitted per-call path.
    packed = pack_params(params)

    fwd = jax.jit(bilstm_attention_forward)
    logits, pred = fwd(x, packed, h0, c0)
    jax.block_until_ready((logits, pred))
    assert logits.shape == (batch, num_classes) and pred.shape == (batch,)

    ref_logits, _ = reference_forward(x, params, h0, c0)
    max_err = float(jnp.max(jnp.abs(logits - ref_logits)))
    assert max_err < 5e-2, f"logits mismatch vs reference: {max_err}"
    print("KERNEL_OK")
</pallas_src>

<mosaic_0001>
module attributes {stable_mosaic.version = 11 : i64} {
  func.func @bilstm_attention_kernel(%arg0: memref<16x16xf32, #tpu.memory_space<vmem>>, %arg1: memref<16x512xf32, #tpu.memory_space<vmem>>, %arg2: memref<16x512xf32, #tpu.memory_space<vmem>>, %arg3: memref<1x512xf32, #tpu.memory_space<vmem>>, %arg4: memref<1x512xf32, #tpu.memory_space<vmem>>, %arg5: memref<10x512xf32, #tpu.memory_space<vmem>>, %arg6: memref<2x128xf32, #tpu.memory_space<vmem>>, %arg7: memref<2x128xf32, #tpu.memory_space<vmem>>, %arg8: memref<2x128xf32, #tpu.memory_space<vmem>>, %arg9: memref<128x4xf32, #tpu.memory_space<vmem>>, %arg10: memref<128x4xf32, #tpu.memory_space<vmem>>, %arg11: memref<1x4xf32, #tpu.memory_space<vmem>>, %arg12: memref<2x4xf32, #tpu.memory_space<vmem>>, %arg13: memref<2x1xi32, #tpu.memory_space<vmem>>, %arg14: memref<16x512xf32, #tpu.memory_space<vmem>>, %arg15: memref<16x512xf32, #tpu.memory_space<vmem>>) attributes {dimension_semantics = [], scalar_prefetch = 0 : i64, scratch_operands = 2 : i64, tpu.core_type = #tpu.core_type<tc>} {
    %c0 = arith.constant 0 : index
    %c0_0 = arith.constant 0 : index
    %0 = vector.load %arg0[%c0, %c0_0] : memref<16x16xf32, #tpu.memory_space<vmem>>, vector<16x16xf32>
    %c0_1 = arith.constant 0 : index
    %c0_2 = arith.constant 0 : index
    %1 = vector.load %arg1[%c0_1, %c0_2] : memref<16x512xf32, #tpu.memory_space<vmem>>, vector<16x512xf32>
    %cst = arith.constant dense<0.000000e+00> : vector<16x512xf32>
    %2 = tpu.matmul %0, %1, %cst {dimension_numbers = #tpu.dot_dimension_numbers<[1], [0], [0], [1], [0, 0, 1, 1], [], []>} : vector<16x16xf32>, vector<16x512xf32>, vector<16x512xf32> -> vector<16x512xf32>
    %c0_3 = arith.constant 0 : index
    %c0_4 = arith.constant 0 : index
    %3 = vector.load %arg3[%c0_3, %c0_4] : memref<1x512xf32, #tpu.memory_space<vmem>>, vector<1x512xf32>
    %4 = vector.broadcast %3 : vector<1x512xf32> to vector<16x512xf32>
    %5 = arith.addf %2, %4 : vector<16x512xf32>
    %c0_5 = arith.constant 0 : index
    %c0_6 = arith.constant 0 : index
    %6 = vector.load %arg14[%c0_5, %c0_6] : memref<16x512xf32, #tpu.memory_space<vmem>>, vector<16x512xf32>
    tpu.vector_store %arg14[%c0_5, %c0_6], %5 {strides = array<i32>} : memref<16x512xf32, #tpu.memory_space<vmem>>, vector<16x512xf32>,
    %c0_7 = arith.constant 0 : index
    %c0_8 = arith.constant 0 : index
    %7 = vector.load %arg2[%c0_7, %c0_8] : memref<16x512xf32, #tpu.memory_space<vmem>>, vector<16x512xf32>
    %cst_9 = arith.constant dense<0.000000e+00> : vector<16x512xf32>
    %8 = tpu.matmul %0, %7, %cst_9 {dimension_numbers = #tpu.dot_dimension_numbers<[1], [0], [0], [1], [0, 0, 1, 1], [], []>} : vector<16x16xf32>, vector<16x512xf32>, vector<16x512xf32> -> vector<16x512xf32>
    %c0_10 = arith.constant 0 : index
    %c0_11 = arith.constant 0 : index
    %9 = vector.load %arg4[%c0_10, %c0_11] : memref<1x512xf32, #tpu.memory_space<vmem>>, vector<1x512xf32>
    %10 = vector.broadcast %9 : vector<1x512xf32> to vector<16x512xf32>
    %11 = arith.addf %8, %10 : vector<16x512xf32>
    %c0_12 = arith.constant 0 : index
    %c0_13 = arith.constant 0 : index
    %12 = vector.load %arg15[%c0_12, %c0_13] : memref<16x512xf32, #tpu.memory_space<vmem>>, vector<16x512xf32>
    tpu.vector_store %arg15[%c0_12, %c0_13], %11 {strides = array<i32>} : memref<16x512xf32, #tpu.memory_space<vmem>>, vector<16x512xf32>,
    %c0_14 = arith.constant 0 : index
    %c0_15 = arith.constant 0 : index
    %13 = vector.load %arg5[%c0_14, %c0_15] : memref<10x512xf32, #tpu.memory_space<vmem>>, vector<10x512xf32>
    %c0_16 = arith.constant 0 : index
    %c0_17 = arith.constant 0 : index
    %14 = vector.load %arg6[%c0_16, %c0_17] : memref<2x128xf32, #tpu.memory_space<vmem>>, vector<2x128xf32>
    %c0_18 = arith.constant 0 : index
    %c0_19 = arith.constant 0 : index
    %15 = vector.load %arg7[%c0_18, %c0_19] : memref<2x128xf32, #tpu.memory_space<vmem>>, vector<2x128xf32>
    %16 = arith.addf %14, %15 : vector<2x128xf32>
    %c0_20 = arith.constant 0 : index
    %c0_21 = arith.constant 0 : index
    %17 = vector.load %arg8[%c0_20, %c0_21] : memref<2x128xf32, #tpu.memory_space<vmem>>, vector<2x128xf32>
    %c0_22 = arith.constant 0 : index
    %c0_23 = arith.constant 0 : index
    %18 = vector.load %arg14[%c0_22, %c0_23] : memref<16x512xf32, #tpu.memory_space<vmem>>, vector<2x512xf32>
    %c14 = arith.constant 14 : index
    %c0_24 = arith.constant 0 : index
    %19 = vector.load %arg15[%c14, %c0_24] : memref<16x512xf32, #tpu.memory_space<vmem>>, vector<2x512xf32>
    %20 = arith.addf %18, %19 : vector<2x512xf32>
    %21 = vector.extract_strided_slice %16 {offsets = [0, 0], sizes = [2, 10], strides = [1, 1]} : vector<2x128xf32> to vector<2x10xf32>
    %cst_25 = arith.constant dense<0.000000e+00> : vector<2x512xf32>
    %22 = tpu.matmul %21, %13, %cst_25 {dimension_numbers = #tpu.dot_dimension_numbers<[1], [0], [0], [1], [0, 0, 1, 1], [], []>} : vector<2x10xf32>, vector<10x512xf32>, vector<2x512xf32> -> vector<2x512xf32>
    %23 = arith.addf %20, %22 : vector<2x512xf32>
    %24 = vector.extract_strided_slice %23 {offsets = [0, 0], sizes = [2, 384], strides = [1, 1]} : vector<2x512xf32> to vector<2x384xf32>
    %25 = arith.negf %24 : vector<2x384xf32>
    %26 = math.exp %25 : vector<2x384xf32>
    %cst_26 = arith.constant 1.000000e+00 : f32
    %27 = vector.broadcast %cst_26 : f32 to vector<2x384xf32>
    %28 = arith.addf %27, %26 : vector<2x384xf32>
    %29 = arith.divf %27, %28 : vector<2x384xf32>
    %30 = vector.extract_strided_slice %23 {offsets = [0, 384], sizes = [2, 128], strides = [1, 1]} : vector<2x512xf32> to vector<2x128xf32>
    %31 = math.tanh %30 : vector<2x128xf32>
    %32 = vector.extract_strided_slice %29 {offsets = [0, 0], sizes = [2, 128], strides = [1, 1]} : vector<2x384xf32> to vector<2x128xf32>
    %33 = vector.extract_strided_slice %29 {offsets = [0, 128], sizes = [2, 128], strides = [1, 1]} : vector<2x384xf32> to vector<2x128xf32>
    %34 = vector.extract_strided_slice %29 {offsets = [0, 256], sizes = [2, 128], strides = [1, 1]} : vector<2x384xf32> to vector<2x128xf32>
    %35 = arith.mulf %33, %17 : vector<2x128xf32>
    %36 = arith.mulf %32, %31 : vector<2x128xf32>
    %37 = arith.addf %35, %36 : vector<2x128xf32>
    %38 = math.tanh %37 : vector<2x128xf32>
    %39 = arith.mulf %34, %38 : vector<2x128xf32>
    %c2 = arith.constant 2 : index
    %c0_27 = arith.constant 0 : index
    %40 = vector.load %arg14[%c2, %c0_27] : memref<16x512xf32, #tpu.memory_space<vmem>>, vector<2x512xf32>
    %c12 = arith.constant 12 : index
    %c0_28 = arith.constant 0 : index
    %41 = vector.load %arg15[%c12, %c0_28] : memref<16x512xf32, #tpu.memory_space<vmem>>, vector<2x512xf32>
    %42 = arith.addf %40, %41 : vector<2x512xf32>
    %43 = vector.extract_strided_slice %39 {offsets = [0, 0], sizes = [2, 10], strides = [1, 1]} : vector<2x128xf32> to vector<2x10xf32>
    %cst_29 = arith.constant dense<0.000000e+00> : vector<2x512xf32>
    %44 = tpu.matmul %43, %13, %cst_29 {dimension_numbers = #tpu.dot_dimension_numbers<[1], [0], [0], [1], [0, 0, 1, 1], [], []>} : vector<2x10xf32>, vector<10x512xf32>, vector<2x512xf32> -> vector<2x512xf32>
    %45 = arith.addf %42, %44 : vector<2x512xf32>
    %46 = vector.extract_strided_slice %45 {offsets = [0, 0], sizes = [2, 384], strides = [1, 1]} : vector<2x512xf32> to vector<2x384xf32>
    %47 = arith.negf %46 : vector<2x384xf32>
    %48 = math.exp %47 : vector<2x384xf32>
    %cst_30 = arith.constant 1.000000e+00 : f32
    %49 = vector.broadcast %cst_30 : f32 to vector<2x384xf32>
    %50 = arith.addf %49, %48 : vector<2x384xf32>
    %51 = arith.divf %49, %50 : vector<2x384xf32>
    %52 = vector.extract_strided_slice %45 {offsets = [0, 384], sizes = [2, 128], strides = [1, 1]} : vector<2x512xf32> to vector<2x128xf32>
    %53 = math.tanh %52 : vector<2x128xf32>
    %54 = vector.extract_strided_slice %51 {offsets = [0, 0], sizes = [2, 128], strides = [1, 1]} : vector<2x384xf32> to vector<2x128xf32>
    %55 = vector.extract_strided_slice %51 {offsets = [0, 128], sizes = [2, 128], strides = [1, 1]} : vector<2x384xf32> to vector<2x128xf32>
    %56 = vector.extract_strided_slice %51 {offsets = [0, 256], sizes = [2, 128], strides = [1, 1]} : vector<2x384xf32> to vector<2x128xf32>
    %57 = arith.mulf %55, %37 : vector<2x128xf32>
    %58 = arith.mulf %54, %53 : vector<2x128xf32>
    %59 = arith.addf %57, %58 : vector<2x128xf32>
    %60 = math.tanh %59 : vector<2x128xf32>
    %61 = arith.mulf %56, %60 : vector<2x128xf32>
    %c4 = arith.constant 4 : index
    %c0_31 = arith.constant 0 : index
    %62 = vector.load %arg14[%c4, %c0_31] : memref<16x512xf32, #tpu.memory_space<vmem>>, vector<2x512xf32>
    %c10 = arith.constant 10 : index
    %c0_32 = arith.constant 0 : index
    %63 = vector.load %arg15[%c10, %c0_32] : memref<16x512xf32, #tpu.memory_space<vmem>>, vector<2x512xf32>
    %64 = arith.addf %62, %63 : vector<2x512xf32>
    %65 = vector.extract_strided_slice %61 {offsets = [0, 0], sizes = [2, 10], strides = [1, 1]} : vector<2x128xf32> to vector<2x10xf32>
    %cst_33 = arith.constant dense<0.000000e+00> : vector<2x512xf32>
    %66 = tpu.matmul %65, %13, %cst_33 {dimension_numbers = #tpu.dot_dimension_numbers<[1], [0], [0], [1], [0, 0, 1, 1], [], []>} : vector<2x10xf32>, vector<10x512xf32>, vector<2x512xf32> -> vector<2x512xf32>
    %67 = arith.addf %64, %66 : vector<2x512xf32>
    %68 = vector.extract_strided_slice %67 {offsets = [0, 0], sizes = [2, 384], strides = [1, 1]} : vector<2x512xf32> to vector<2x384xf32>
    %69 = arith.negf %68 : vector<2x384xf32>
    %70 = math.exp %69 : vector<2x384xf32>
    %cst_34 = arith.constant 1.000000e+00 : f32
    %71 = vector.broadcast %cst_34 : f32 to vector<2x384xf32>
    %72 = arith.addf %71, %70 : vector<2x384xf32>
    %73 = arith.divf %71, %72 : vector<2x384xf32>
    %74 = vector.extract_strided_slice %67 {offsets = [0, 384], sizes = [2, 128], strides = [1, 1]} : vector<2x512xf32> to vector<2x128xf32>
    %75 = math.tanh %74 : vector<2x128xf32>
    %76 = vector.extract_strided_slice %73 {offsets = [0, 0], sizes = [2, 128], strides = [1, 1]} : vector<2x384xf32> to vector<2x128xf32>
    %77 = vector.extract_strided_slice %73 {offsets = [0, 128], sizes = [2, 128], strides = [1, 1]} : vector<2x384xf32> to vector<2x128xf32>
    %78 = vector.extract_strided_slice %73 {offsets = [0, 256], sizes = [2, 128], strides = [1, 1]} : vector<2x384xf32> to vector<2x128xf32>
    %79 = arith.mulf %77, %59 : vector<2x128xf32>
    %80 = arith.mulf %76, %75 : vector<2x128xf32>
    %81 = arith.addf %79, %80 : vector<2x128xf32>
    %82 = math.tanh %81 : vector<2x128xf32>
    %83 = arith.mulf %78, %82 : vector<2x128xf32>
    %c6 = arith.constant 6 : index
    %c0_35 = arith.constant 0 : index
    %84 = vector.load %arg14[%c6, %c0_35] : memref<16x512xf32, #tpu.memory_space<vmem>>, vector<2x512xf32>
    %c8 = arith.constant 8 : index
    %c0_36 = arith.constant 0 : index
    %85 = vector.load %arg15[%c8, %c0_36] : memref<16x512xf32, #tpu.memory_space<vmem>>, vector<2x512xf32>
    %86 = arith.addf %84, %85 : vector<2x512xf32>
    %87 = vector.extract_strided_slice %83 {offsets = [0, 0], sizes = [2, 10], strides = [1, 1]} : vector<2x128xf32> to vector<2x10xf32>
    %cst_37 = arith.constant dense<0.000000e+00> : vector<2x512xf32>
    %88 = tpu.matmul %87, %13, %cst_37 {dimension_numbers = #tpu.dot_dimension_numbers<[1], [0], [0], [1], [0, 0, 1, 1], [], []>} : vector<2x10xf32>, vector<10x512xf32>, vector<2x512xf32> -> vector<2x512xf32>
    %89 = arith.addf %86, %88 : vector<2x512xf32>
    %90 = vector.extract_strided_slice %89 {offsets = [0, 0], sizes = [2, 384], strides = [1, 1]} : vector<2x512xf32> to vector<2x384xf32>
    %91 = arith.negf %90 : vector<2x384xf32>
    %92 = math.exp %91 : vector<2x384xf32>
    %cst_38 = arith.constant 1.000000e+00 : f32
    %93 = vector.broadcast %cst_38 : f32 to vector<2x384xf32>
    %94 = arith.addf %93, %92 : vector<2x384xf32>
    %95 = arith.divf %93, %94 : vector<2x384xf32>
    %96 = vector.extract_strided_slice %89 {offsets = [0, 384], sizes = [2, 128], strides = [1, 1]} : vector<2x512xf32> to vector<2x128xf32>
    %97 = math.tanh %96 : vector<2x128xf32>
    %98 = vector.extract_strided_slice %95 {offsets = [0, 0], sizes = [2, 128], strides = [1, 1]} : vector<2x384xf32> to vector<2x128xf32>
    %99 = vector.extract_strided_slice %95 {offsets = [0, 128], sizes = [2, 128], strides = [1, 1]} : vector<2x384xf32> to vector<2x128xf32>
    %100 = vector.extract_strided_slice %95 {offsets = [0, 256], sizes = [2, 128], strides = [1, 1]} : vector<2x384xf32> to vector<2x128xf32>
    %101 = arith.mulf %99, %81 : vector<2x128xf32>
    %102 = arith.mulf %98, %97 : vector<2x128xf32>
    %103 = arith.addf %101, %102 : vector<2x128xf32>
    %104 = math.tanh %103 : vector<2x128xf32>
    %105 = arith.mulf %100, %104 : vector<2x128xf32>
    %c8_39 = arith.constant 8 : index
    %c0_40 = arith.constant 0 : index
    %106 = vector.load %arg14[%c8_39, %c0_40] : memref<16x512xf32, #tpu.memory_space<vmem>>, vector<2x512xf32>
    %c6_41 = arith.constant 6 : index
    %c0_42 = arith.constant 0 : index
    %107 = vector.load %arg15[%c6_41, %c0_42] : memref<16x512xf32, #tpu.memory_space<vmem>>, vector<2x512xf32>
    %108 = arith.addf %106, %107 : vector<2x512xf32>
    %109 = vector.extract_strided_slice %105 {offsets = [0, 0], sizes = [2, 10], strides = [1, 1]} : vector<2x128xf32> to vector<2x10xf32>
    %cst_43 = arith.constant dense<0.000000e+00> : vector<2x512xf32>
    %110 = tpu.matmul %109, %13, %cst_43 {dimension_numbers = #tpu.dot_dimension_numbers<[1], [0], [0], [1], [0, 0, 1, 1], [], []>} : vector<2x10xf32>, vector<10x512xf32>, vector<2x512xf32> -> vector<2x512xf32>
    %111 = arith.addf %108, %110 : vector<2x512xf32>
    %112 = vector.extract_strided_slice %111 {offsets = [0, 0], sizes = [2, 384], strides = [1, 1]} : vector<2x512xf32> to vector<2x384xf32>
    %113 = arith.negf %112 : vector<2x384xf32>
    %114 = math.exp %113 : vector<2x384xf32>
    %cst_44 = arith.constant 1.000000e+00 : f32
    %115 = vector.broadcast %cst_44 : f32 to vector<2x384xf32>
    %116 = arith.addf %115, %114 : vector<2x384xf32>
    %117 = arith.divf %115, %116 : vector<2x384xf32>
    %118 = vector.extract_strided_slice %111 {offsets = [0, 384], sizes = [2, 128], strides = [1, 1]} : vector<2x512xf32> to vector<2x128xf32>
    %119 = math.tanh %118 : vector<2x128xf32>
    %120 = vector.extract_strided_slice %117 {offsets = [0, 0], sizes = [2, 128], strides = [1, 1]} : vector<2x384xf32> to vector<2x128xf32>
    %121 = vector.extract_strided_slice %117 {offsets = [0, 128], sizes = [2, 128], strides = [1, 1]} : vector<2x384xf32> to vector<2x128xf32>
    %122 = vector.extract_strided_slice %117 {offsets = [0, 256], sizes = [2, 128], strides = [1, 1]} : vector<2x384xf32> to vector<2x128xf32>
    %123 = arith.mulf %121, %103 : vector<2x128xf32>
    %124 = arith.mulf %120, %119 : vector<2x128xf32>
    %125 = arith.addf %123, %124 : vector<2x128xf32>
    %126 = math.tanh %125 : vector<2x128xf32>
    %127 = arith.mulf %122, %126 : vector<2x128xf32>
    %c10_45 = arith.constant 10 : index
    %c0_46 = arith.constant 0 : index
    %128 = vector.load %arg14[%c10_45, %c0_46] : memref<16x512xf32, #tpu.memory_space<vmem>>, vector<2x512xf32>
    %c4_47 = arith.constant 4 : index
    %c0_48 = arith.constant 0 : index
    %129 = vector.load %arg15[%c4_47, %c0_48] : memref<16x512xf32, #tpu.memory_space<vmem>>, vector<2x512xf32>
    %130 = arith.addf %128, %129 : vector<2x512xf32>
    %131 = vector.extract_strided_slice %127 {offsets = [0, 0], sizes = [2, 10], strides = [1, 1]} : vector<2x128xf32> to vector<2x10xf32>
    %cst_49 = arith.constant dense<0.000000e+00> : vector<2x512xf32>
    %132 = tpu.matmul %131, %13, %cst_49 {dimension_numbers = #tpu.dot_dimension_numbers<[1], [0], [0], [1], [0, 0, 1, 1], [], []>} : vector<2x10xf32>, vector<10x512xf32>, vector<2x512xf32> -> vector<2x512xf32>
    %133 = arith.addf %130, %132 : vector<2x512xf32>
    %134 = vector.extract_strided_slice %133 {offsets = [0, 0], sizes = [2, 384], strides = [1, 1]} : vector<2x512xf32> to vector<2x384xf32>
    %135 = arith.negf %134 : vector<2x384xf32>
    %136 = math.exp %135 : vector<2x384xf32>
    %cst_50 = arith.constant 1.000000e+00 : f32
    %137 = vector.broadcast %cst_50 : f32 to vector<2x384xf32>
    %138 = arith.addf %137, %136 : vector<2x384xf32>
    %139 = arith.divf %137, %138 : vector<2x384xf32>
    %140 = vector.extract_strided_slice %133 {offsets = [0, 384], sizes = [2, 128], strides = [1, 1]} : vector<2x512xf32> to vector<2x128xf32>
    %141 = math.tanh %140 : vector<2x128xf32>
    %142 = vector.extract_strided_slice %139 {offsets = [0, 0], sizes = [2, 128], strides = [1, 1]} : vector<2x384xf32> to vector<2x128xf32>
    %143 = vector.extract_strided_slice %139 {offsets = [0, 128], sizes = [2, 128], strides = [1, 1]} : vector<2x384xf32> to vector<2x128xf32>
    %144 = vector.extract_strided_slice %139 {offsets = [0, 256], sizes = [2, 128], strides = [1, 1]} : vector<2x384xf32> to vector<2x128xf32>
    %145 = arith.mulf %143, %125 : vector<2x128xf32>
    %146 = arith.mulf %142, %141 : vector<2x128xf32>
    %147 = arith.addf %145, %146 : vector<2x128xf32>
    %148 = math.tanh %147 : vector<2x128xf32>
    %149 = arith.mulf %144, %148 : vector<2x128xf32>
    %c12_51 = arith.constant 12 : index
    %c0_52 = arith.constant 0 : index
    %150 = vector.load %arg14[%c12_51, %c0_52] : memref<16x512xf32, #tpu.memory_space<vmem>>, vector<2x512xf32>
    %c2_53 = arith.constant 2 : index
    %c0_54 = arith.constant 0 : index
    %151 = vector.load %arg15[%c2_53, %c0_54] : memref<16x512xf32, #tpu.memory_space<vmem>>, vector<2x512xf32>
    %152 = arith.addf %150, %151 : vector<2x512xf32>
    %153 = vector.extract_strided_slice %149 {offsets = [0, 0], sizes = [2, 10], strides = [1, 1]} : vector<2x128xf32> to vector<2x10xf32>
    %cst_55 = arith.constant dense<0.000000e+00> : vector<2x512xf32>
    %154 = tpu.matmul %153, %13, %cst_55 {dimension_numbers = #tpu.dot_dimension_numbers<[1], [0], [0], [1], [0, 0, 1, 1], [], []>} : vector<2x10xf32>, vector<10x512xf32>, vector<2x512xf32> -> vector<2x512xf32>
    %155 = arith.addf %152, %154 : vector<2x512xf32>
    %156 = vector.extract_strided_slice %155 {offsets = [0, 0], sizes = [2, 384], strides = [1, 1]} : vector<2x512xf32> to vector<2x384xf32>
    %157 = arith.negf %156 : vector<2x384xf32>
    %158 = math.exp %157 : vector<2x384xf32>
    %cst_56 = arith.constant 1.000000e+00 : f32
    %159 = vector.broadcast %cst_56 : f32 to vector<2x384xf32>
    %160 = arith.addf %159, %158 : vector<2x384xf32>
    %161 = arith.divf %159, %160 : vector<2x384xf32>
    %162 = vector.extract_strided_slice %155 {offsets = [0, 384], sizes = [2, 128], strides = [1, 1]} : vector<2x512xf32> to vector<2x128xf32>
    %163 = math.tanh %162 : vector<2x128xf32>
    %164 = vector.extract_strided_slice %161 {offsets = [0, 0], sizes = [2, 128], strides = [1, 1]} : vector<2x384xf32> to vector<2x128xf32>
    %165 = vector.extract_strided_slice %161 {offsets = [0, 128], sizes = [2, 128], strides = [1, 1]} : vector<2x384xf32> to vector<2x128xf32>
    %166 = vector.extract_strided_slice %161 {offsets = [0, 256], sizes = [2, 128], strides = [1, 1]} : vector<2x384xf32> to vector<2x128xf32>
    %167 = arith.mulf %165, %147 : vector<2x128xf32>
    %168 = arith.mulf %164, %163 : vector<2x128xf32>
    %169 = arith.addf %167, %168 : vector<2x128xf32>
    %170 = math.tanh %169 : vector<2x128xf32>
    %171 = arith.mulf %166, %170 : vector<2x128xf32>
    %c14_57 = arith.constant 14 : index
    %c0_58 = arith.constant 0 : index
    %172 = vector.load %arg14[%c14_57, %c0_58] : memref<16x512xf32, #tpu.memory_space<vmem>>, vector<2x512xf32>
    %c0_59 = arith.constant 0 : index
    %c0_60 = arith.constant 0 : index
    %173 = vector.load %arg15[%c0_59, %c0_60] : memref<16x512xf32, #tpu.memory_space<vmem>>, vector<2x512xf32>
    %174 = arith.addf %172, %173 : vector<2x512xf32>
    %175 = vector.extract_strided_slice %171 {offsets = [0, 0], sizes = [2, 10], strides = [1, 1]} : vector<2x128xf32> to vector<2x10xf32>
    %cst_61 = arith.constant dense<0.000000e+00> : vector<2x512xf32>
    %176 = tpu.matmul %175, %13, %cst_61 {dimension_numbers = #tpu.dot_dimension_numbers<[1], [0], [0], [1], [0, 0, 1, 1], [], []>} : vector<2x10xf32>, vector<10x512xf32>, vector<2x512xf32> -> vector<2x512xf32>
    %177 = arith.addf %174, %176 : vector<2x512xf32>
    %178 = vector.extract_strided_slice %177 {offsets = [0, 0], sizes = [2, 384], strides = [1, 1]} : vector<2x512xf32> to vector<2x384xf32>
    %179 = arith.negf %178 : vector<2x384xf32>
    %180 = math.exp %179 : vector<2x384xf32>
    %cst_62 = arith.constant 1.000000e+00 : f32
    %181 = vector.broadcast %cst_62 : f32 to vector<2x384xf32>
    %182 = arith.addf %181, %180 : vector<2x384xf32>
    %183 = arith.divf %181, %182 : vector<2x384xf32>
    %184 = vector.extract_strided_slice %177 {offsets = [0, 384], sizes = [2, 128], strides = [1, 1]} : vector<2x512xf32> to vector<2x128xf32>
    %185 = math.tanh %184 : vector<2x128xf32>
    %186 = vector.extract_strided_slice %183 {offsets = [0, 0], sizes = [2, 128], strides = [1, 1]} : vector<2x384xf32> to vector<2x128xf32>
    %187 = vector.extract_strided_slice %183 {offsets = [0, 128], sizes = [2, 128], strides = [1, 1]} : vector<2x384xf32> to vector<2x128xf32>
    %188 = vector.extract_strided_slice %183 {offsets = [0, 256], sizes = [2, 128], strides = [1, 1]} : vector<2x384xf32> to vector<2x128xf32>
    %189 = arith.mulf %187, %169 : vector<2x128xf32>
    %190 = arith.mulf %186, %185 : vector<2x128xf32>
    %191 = arith.addf %189, %190 : vector<2x128xf32>
    %192 = math.tanh %191 : vector<2x128xf32>
    %193 = arith.mulf %188, %192 : vector<2x128xf32>
    %c0_63 = arith.constant 0 : index
    %c0_64 = arith.constant 0 : index
    %194 = vector.load %arg6[%c0_63, %c0_64] : memref<2x128xf32, #tpu.memory_space<vmem>>, vector<2x128xf32>
    %c0_65 = arith.constant 0 : index
    %c0_66 = arith.constant 0 : index
    %195 = vector.load %arg7[%c0_65, %c0_66] : memref<2x128xf32, #tpu.memory_space<vmem>>, vector<2x128xf32>
    %196 = arith.mulf %39, %194 : vector<2x128xf32>
    %cst_67 = arith.constant dense<0.000000e+00> : vector<2xf32>
    %197 = vector.multi_reduction <add>, %196, %cst_67 [1] : vector<2x128xf32> to vector<2xf32>
    %198 = vector.shape_cast %197 : vector<2xf32> to vector<2x1xf32>
    %199 = arith.mulf %61, %194 : vector<2x128xf32>
    %cst_68 = arith.constant dense<0.000000e+00> : vector<2xf32>
    %200 = vector.multi_reduction <add>, %199, %cst_68 [1] : vector<2x128xf32> to vector<2xf32>
    %201 = vector.shape_cast %200 : vector<2xf32> to vector<2x1xf32>
    %202 = arith.mulf %83, %194 : vector<2x128xf32>
    %cst_69 = arith.constant dense<0.000000e+00> : vector<2xf32>
    %203 = vector.multi_reduction <add>, %202, %cst_69 [1] : vector<2x128xf32> to vector<2xf32>
    %204 = vector.shape_cast %203 : vector<2xf32> to vector<2x1xf32>
    %205 = arith.mulf %105, %194 : vector<2x128xf32>
    %cst_70 = arith.constant dense<0.000000e+00> : vector<2xf32>
    %206 = vector.multi_reduction <add>, %205, %cst_70 [1] : vector<2x128xf32> to vector<2xf32>
    %207 = vector.shape_cast %206 : vector<2xf32> to vector<2x1xf32>
    %208 = arith.mulf %127, %194 : vector<2x128xf32>
    %cst_71 = arith.constant dense<0.000000e+00> : vector<2xf32>
    %209 = vector.multi_reduction <add>, %208, %cst_71 [1] : vector<2x128xf32> to vector<2xf32>
    %210 = vector.shape_cast %209 : vector<2xf32> to vector<2x1xf32>
    %211 = arith.mulf %149, %194 : vector<2x128xf32>
    %cst_72 = arith.constant dense<0.000000e+00> : vector<2xf32>
    %212 = vector.multi_reduction <add>, %211, %cst_72 [1] : vector<2x128xf32> to vector<2xf32>
    %213 = vector.shape_cast %212 : vector<2xf32> to vector<2x1xf32>
    %214 = arith.mulf %171, %194 : vector<2x128xf32>
    %cst_73 = arith.constant dense<0.000000e+00> : vector<2xf32>
    %215 = vector.multi_reduction <add>, %214, %cst_73 [1] : vector<2x128xf32> to vector<2xf32>
    %216 = vector.shape_cast %215 : vector<2xf32> to vector<2x1xf32>
    %217 = arith.mulf %193, %194 : vector<2x128xf32>
    %cst_74 = arith.constant dense<0.000000e+00> : vector<2xf32>
    %218 = vector.multi_reduction <add>, %217, %cst_74 [1] : vector<2x128xf32> to vector<2xf32>
    %219 = vector.shape_cast %218 : vector<2xf32> to vector<2x1xf32>
    %220 = arith.mulf %39, %195 : vector<2x128xf32>
    %cst_75 = arith.constant dense<0.000000e+00> : vector<2xf32>
    %221 = vector.multi_reduction <add>, %220, %cst_75 [1] : vector<2x128xf32> to vector<2xf32>
    %222 = vector.shape_cast %221 : vector<2xf32> to vector<2x1xf32>
    %223 = arith.mulf %61, %195 : vector<2x128xf32>
    %cst_76 = arith.constant dense<0.000000e+00> : vector<2xf32>
    %224 = vector.multi_reduction <add>, %223, %cst_76 [1] : vector<2x128xf32> to vector<2xf32>
    %225 = vector.shape_cast %224 : vector<2xf32> to vector<2x1xf32>
    %226 = arith.mulf %83, %195 : vector<2x128xf32>
    %cst_77 = arith.constant dense<0.000000e+00> : vector<2xf32>
    %227 = vector.multi_reduction <add>, %226, %cst_77 [1] : vector<2x128xf32> to vector<2xf32>
    %228 = vector.shape_cast %227 : vector<2xf32> to vector<2x1xf32>
    %229 = arith.mulf %105, %195 : vector<2x128xf32>
    %cst_78 = arith.constant dense<0.000000e+00> : vector<2xf32>
    %230 = vector.multi_reduction <add>, %229, %cst_78 [1] : vector<2x128xf32> to vector<2xf32>
    %231 = vector.shape_cast %230 : vector<2xf32> to vector<2x1xf32>
    %232 = arith.mulf %127, %195 : vector<2x128xf32>
    %cst_79 = arith.constant dense<0.000000e+00> : vector<2xf32>
    %233 = vector.multi_reduction <add>, %232, %cst_79 [1] : vector<2x128xf32> to vector<2xf32>
    %234 = vector.shape_cast %233 : vector<2xf32> to vector<2x1xf32>
    %235 = arith.mulf %149, %195 : vector<2x128xf32>
    %cst_80 = arith.constant dense<0.000000e+00> : vector<2xf32>
    %236 = vector.multi_reduction <add>, %235, %cst_80 [1] : vector<2x128xf32> to vector<2xf32>
    %237 = vector.shape_cast %236 : vector<2xf32> to vector<2x1xf32>
    %238 = arith.mulf %171, %195 : vector<2x128xf32>
    %cst_81 = arith.constant dense<0.000000e+00> : vector<2xf32>
    %239 = vector.multi_reduction <add>, %238, %cst_81 [1] : vector<2x128xf32> to vector<2xf32>
    %240 = vector.shape_cast %239 : vector<2xf32> to vector<2x1xf32>
    %241 = arith.mulf %193, %195 : vector<2x128xf32>
    %cst_82 = arith.constant dense<0.000000e+00> : vector<2xf32>
    %242 = vector.multi_reduction <add>, %241, %cst_82 [1] : vector<2x128xf32> to vector<2xf32>
    %243 = vector.shape_cast %242 : vector<2xf32> to vector<2x1xf32>
    %244 = arith.addf %198, %243 : vector<2x1xf32>
    %245 = arith.addf %201, %240 : vector<2x1xf32>
    %246 = arith.addf %204, %237 : vector<2x1xf32>
    %247 = arith.addf %207, %234 : vector<2x1xf32>
    %248 = arith.addf %210, %231 : vector<2x1xf32>
    %249 = arith.addf %213, %228 : vector<2x1xf32>
    %250 = arith.addf %216, %225 : vector<2x1xf32>
    %251 = arith.addf %219, %222 : vector<2x1xf32>
    %252 = arith.maximumf %244, %245 : vector<2x1xf32>
    %253 = arith.maximumf %252, %246 : vector<2x1xf32>
    %254 = arith.maximumf %253, %247 : vector<2x1xf32>
    %255 = arith.maximumf %254, %248 : vector<2x1xf32>
    %256 = arith.maximumf %255, %249 : vector<2x1xf32>
    %257 = arith.maximumf %256, %250 : vector<2x1xf32>
    %258 = arith.maximumf %257, %251 : vector<2x1xf32>
    %259 = arith.subf %244, %258 : vector<2x1xf32>
    %260 = math.exp %259 : vector<2x1xf32>
    %261 = arith.subf %245, %258 : vector<2x1xf32>
    %262 = math.exp %261 : vector<2x1xf32>
    %263 = arith.subf %246, %258 : vector<2x1xf32>
    %264 = math.exp %263 : vector<2x1xf32>
    %265 = arith.subf %247, %258 : vector<2x1xf32>
    %266 = math.exp %265 : vector<2x1xf32>
    %267 = arith.subf %248, %258 : vector<2x1xf32>
    %268 = math.exp %267 : vector<2x1xf32>
    %269 = arith.subf %249, %258 : vector<2x1xf32>
    %270 = math.exp %269 : vector<2x1xf32>
    %271 = arith.subf %250, %258 : vector<2x1xf32>
    %272 = math.exp %271 : vector<2x1xf32>
    %273 = arith.subf %251, %258 : vector<2x1xf32>
    %274 = math.exp %273 : vector<2x1xf32>
    %275 = arith.addf %260, %262 : vector<2x1xf32>
    %276 = arith.addf %275, %264 : vector<2x1xf32>
    %277 = arith.addf %276, %266 : vector<2x1xf32>
    %278 = arith.addf %277, %268 : vector<2x1xf32>
    %279 = arith.addf %278, %270 : vector<2x1xf32>
    %280 = arith.addf %279, %272 : vector<2x1xf32>
    %281 = arith.addf %280, %274 : vector<2x1xf32>
    %282 = tpu.reciprocal %281 : vector<2x1xf32> -> vector<2x1xf32>
    %283 = arith.mulf %260, %282 : vector<2x1xf32>
    %284 = arith.mulf %262, %282 : vector<2x1xf32>
    %285 = arith.mulf %264, %282 : vector<2x1xf32>
    %286 = arith.mulf %266, %282 : vector<2x1xf32>
    %287 = arith.mulf %268, %282 : vector<2x1xf32>
    %288 = arith.mulf %270, %282 : vector<2x1xf32>
    %289 = arith.mulf %272, %282 : vector<2x1xf32>
    %290 = arith.mulf %274, %282 : vector<2x1xf32>
    %291 = vector.broadcast %283 : vector<2x1xf32> to vector<2x128xf32>
    %292 = arith.mulf %291, %39 : vector<2x128xf32>
    %293 = vector.broadcast %283 : vector<2x1xf32> to vector<2x128xf32>
    %294 = arith.mulf %293, %193 : vector<2x128xf32>
    %295 = vector.broadcast %284 : vector<2x1xf32> to vector<2x128xf32>
    %296 = arith.mulf %295, %61 : vector<2x128xf32>
    %297 = arith.addf %292, %296 : vector<2x128xf32>
    %298 = vector.broadcast %284 : vector<2x1xf32> to vector<2x128xf32>
    %299 = arith.mulf %298, %171 : vector<2x128xf32>
    %300 = arith.addf %294, %299 : vector<2x128xf32>
    %301 = vector.broadcast %285 : vector<2x1xf32> to vector<2x128xf32>
    %302 = arith.mulf %301, %83 : vector<2x128xf32>
    %303 = arith.addf %297, %302 : vector<2x128xf32>
    %304 = vector.broadcast %285 : vector<2x1xf32> to vector<2x128xf32>
    %305 = arith.mulf %304, %149 : vector<2x128xf32>
    %306 = arith.addf %300, %305 : vector<2x128xf32>
    %307 = vector.broadcast %286 : vector<2x1xf32> to vector<2x128xf32>
    %308 = arith.mulf %307, %105 : vector<2x128xf32>
    %309 = arith.addf %303, %308 : vector<2x128xf32>
    %310 = vector.broadcast %286 : vector<2x1xf32> to vector<2x128xf32>
    %311 = arith.mulf %310, %127 : vector<2x128xf32>
    %312 = arith.addf %306, %311 : vector<2x128xf32>
    %313 = vector.broadcast %287 : vector<2x1xf32> to vector<2x128xf32>
    %314 = arith.mulf %313, %127 : vector<2x128xf32>
    %315 = arith.addf %309, %314 : vector<2x128xf32>
    %316 = vector.broadcast %287 : vector<2x1xf32> to vector<2x128xf32>
    %317 = arith.mulf %316, %105 : vector<2x128xf32>
    %318 = arith.addf %312, %317 : vector<2x128xf32>
    %319 = vector.broadcast %288 : vector<2x1xf32> to vector<2x128xf32>
    %320 = arith.mulf %319, %149 : vector<2x128xf32>
    %321 = arith.addf %315, %320 : vector<2x128xf32>
    %322 = vector.broadcast %288 : vector<2x1xf32> to vector<2x128xf32>
    %323 = arith.mulf %322, %83 : vector<2x128xf32>
    %324 = arith.addf %318, %323 : vector<2x128xf32>
    %325 = vector.broadcast %289 : vector<2x1xf32> to vector<2x128xf32>
    %326 = arith.mulf %325, %171 : vector<2x128xf32>
    %327 = arith.addf %321, %326 : vector<2x128xf32>
    %328 = vector.broadcast %289 : vector<2x1xf32> to vector<2x128xf32>
    %329 = arith.mulf %328, %61 : vector<2x128xf32>
    %330 = arith.addf %324, %329 : vector<2x128xf32>
    %331 = vector.broadcast %290 : vector<2x1xf32> to vector<2x128xf32>
    %332 = arith.mulf %331, %193 : vector<2x128xf32>
    %333 = arith.addf %327, %332 : vector<2x128xf32>
    %334 = vector.broadcast %290 : vector<2x1xf32> to vector<2x128xf32>
    %335 = arith.mulf %334, %39 : vector<2x128xf32>
    %336 = arith.addf %330, %335 : vector<2x128xf32>
    %c0_83 = arith.constant 0 : index
    %c0_84 = arith.constant 0 : index
    %337 = vector.load %arg9[%c0_83, %c0_84] : memref<128x4xf32, #tpu.memory_space<vmem>>, vector<128x4xf32>
    %cst_85 = arith.constant dense<0.000000e+00> : vector<2x4xf32>
    %338 = tpu.matmul %333, %337, %cst_85 {dimension_numbers = #tpu.dot_dimension_numbers<[1], [0], [0], [1], [0, 0, 1, 1], [], []>} : vector<2x128xf32>, vector<128x4xf32>, vector<2x4xf32> -> vector<2x4xf32>
    %c0_86 = arith.constant 0 : index
    %c0_87 = arith.constant 0 : index
    %339 = vector.load %arg10[%c0_86, %c0_87] : memref<128x4xf32, #tpu.memory_space<vmem>>, vector<128x4xf32>
    %cst_88 = arith.constant dense<0.000000e+00> : vector<2x4xf32>
    %340 = tpu.matmul %336, %339, %cst_88 {dimension_numbers = #tpu.dot_dimension_numbers<[1], [0], [0], [1], [0, 0, 1, 1], [], []>} : vector<2x128xf32>, vector<128x4xf32>, vector<2x4xf32> -> vector<2x4xf32>
    %341 = arith.addf %338, %340 : vector<2x4xf32>
    %c0_89 = arith.constant 0 : index
    %c0_90 = arith.constant 0 : index
    %342 = vector.load %arg11[%c0_89, %c0_90] : memref<1x4xf32, #tpu.memory_space<vmem>>, vector<1x4xf32>
    %343 = vector.broadcast %342 : vector<1x4xf32> to vector<2x4xf32>
    %344 = arith.addf %341, %343 : vector<2x4xf32>
    %c0_91 = arith.constant 0 : index
    %c0_92 = arith.constant 0 : index
    %345 = vector.load %arg12[%c0_91, %c0_92] : memref<2x4xf32, #tpu.memory_space<vmem>>, vector<2x4xf32>
    tpu.vector_store %arg12[%c0_91, %c0_92], %344 {strides = array<i32>} : memref<2x4xf32, #tpu.memory_space<vmem>>, vector<2x4xf32>,
    %cst_93 = arith.constant dense<0xFF800000> : vector<2xf32>
    %346 = vector.multi_reduction <maximumf>, %344, %cst_93 [1] : vector<2x4xf32> to vector<2xf32>
    %347 = vector.shape_cast %346 : vector<2xf32> to vector<2x1xf32>
    %348 = tpu.iota {dimensions = array<i32: 1>} : vector<2x4xi32>
    %349 = vector.broadcast %347 : vector<2x1xf32> to vector<2x4xf32>
    %350 = arith.cmpf oeq, %344, %349 : vector<2x4xf32>
    %c4_i32 = arith.constant 4 : i32
    %351 = vector.broadcast %c4_i32 : i32 to vector<2x4xi32>
    %352 = arith.select %350, %348, %351 : vector<2x4xi1>, vector<2x4xi32>
    %cst_94 = arith.constant dense<2147483647> : vector<2xi32>
    %353 = vector.multi_reduction <minsi>, %352, %cst_94 [1] : vector<2x4xi32> to vector<2xi32>
    %354 = vector.shape_cast %353 : vector<2xi32> to vector<2x1xi32>
    %c0_95 = arith.constant 0 : index
    %c0_96 = arith.constant 0 : index
    %355 = vector.load %arg13[%c0_95, %c0_96] : memref<2x1xi32, #tpu.memory_space<vmem>>, vector<2x1xi32>
    tpu.vector_store %arg13[%c0_95, %c0_96], %354 {strides = array<i32>} : memref<2x1xi32, #tpu.memory_space<vmem>>, vector<2x1xi32>,
    return
  }
}

</mosaic_0001>

<bundles_post_ra>
// kernel: bilstm_attention_forward.1
= control target key start
LH: loop header
LB: loop body
LE: loop exit
PB: predicated region body
PF: predicated region fallthrough
CT: control target
= control target key end

     0   :  { %v3218_v7 = vmov 0.0   ;;  %vm76_vm0 = vcmask 130048   ;;  %vm477_vm1 = vcmask 1041408   ;;  %vm3219_vm2 = vmmov 1   ;;  %s3831_s0 = inlined_call_operand.vmem [shape: f32[16,16], index: 0, kind: input, shape index: {}]   ;;  %s3832_s1 = inlined_call_operand.vmem [shape: f32[16,512], index: 1, kind: input, shape index: {}]   ;;  %s3833_s2 = inlined_call_operand.vmem [shape: f32[16,512], index: 2, kind: input, shape index: {}]   ;;  %s3834_s3 = inlined_call_operand.vmem [shape: f32[1,512], index: 3, kind: input, shape index: {}]   ;;  %s3835_s4 = inlined_call_operand.vmem [shape: f32[1,512], index: 4, kind: input, shape index: {}]   ;;  %s3836_s5 = inlined_call_operand.vmem [shape: f32[10,512], index: 5, kind: input, shape index: {}]   ;;  %s3837_s6 = inlined_call_operand.vmem [shape: f32[2,128], index: 6, kind: input, shape index: {}]   ;;  %s3838_s7 = inlined_call_operand.vmem [shape: f32[2,128], index: 7, kind: input, shape index: {}]   ;;  %s3839_s8 = inlined_call_operand.vmem [shape: f32[2,128], index: 8, kind: input, shape index: {}]   ;;  %s3840_s9 = inlined_call_operand.vmem [shape: f32[128,4], index: 9, kind: input, shape index: {}]   ;;  %s3841_s10 = inlined_call_operand.vmem [shape: f32[128,4], index: 10, kind: input, shape index: {}]   ;;  %s3842_s11 = inlined_call_operand.vmem [shape: f32[1,4], index: 11, kind: input, shape index: {}]   ;;  %s3843_s12 = inlined_call_operand.hbm [shape: f32[2,4], index: 12, kind: output, shape index: {0}]   ;;  %s3844_s13 = inlined_call_operand.vmem [shape: s32[2,1], index: 13, kind: output, shape index: {1}]  }
   0x1   :  { %v47_v0 = vld [vmem:[%s3832_s1 + $0x8] sm:$0xff]  ;;  %v46_v2 = vld [vmem:[%s3832_s1] sm:$0xff]  ;;  %v49_v5 = vld [vmem:[%s3832_s1 + $0x18] sm:$0xff]  ;;  %147 = vmatprep.mubr.f32.mxu0 %v3218_v7  ;;  %224 = vmatprep.mubr.f32.mxu1 %v3218_v7 }
   0x2   :  { %v51_v1 = vld [vmem:[%s3832_s1 + $0x28] sm:$0xff]  ;;  %v50_v4 = vld [vmem:[%s3832_s1 + $0x20] sm:$0xff]  ;;  %v53_v6 = vld [vmem:[%s3832_s1 + $0x38] sm:$0xff] }
   0x3   :  { %v2878_v3 = vpack.c.bf16 %v51_v1, %v47_v0  ;;  %v2880_v8 = vpack.c.bf16 %v50_v4, %v46_v2  ;;  %v2882_v9 = vpack.c.bf16 %v53_v6, %v49_v5  ;;  %v48_v10 = vld [vmem:[%s3832_s1 + $0x10] sm:$0xff]  ;;  %v246_v13 = vld [vmem:[%s3833_s2 + $0x8] sm:$0xff]  ;;  %v245_v15 = vld [vmem:[%s3833_s2] sm:$0xff] }
   0x4   :  { %v52_v11 = vld [vmem:[%s3832_s1 + $0x30] sm:$0xff]  ;;  %v250_v14 = vld [vmem:[%s3833_s2 + $0x28] sm:$0xff]  ;;  %v44_v16 = vld [vmem:[%s3831_s0] sm:$0xff] }
   0x5   :  { %2879 = vmatprep.subr.bf16.mxu0 %v2878_v3  ;;  %v2884_v12 = vpack.c.bf16 %v52_v11, %v48_v10  ;;  %2883 = vmatprep.subr.bf16.mxu1 %v2882_v9  ;;  %v2886_v17 = vpack.c.bf16 %v250_v14, %v246_v13  ;;  %v249_v18 = vld [vmem:[%s3833_s2 + $0x20] sm:$0xff]  ;;  %v248_v19 = vld [vmem:[%s3833_s2 + $0x18] sm:$0xff]  ;;  %v247_v22 = vld [vmem:[%s3833_s2 + $0x10] sm:$0xff] }
   0x6   :  { %2881 = vmatpush1.bf16.msra.mxu0 %v2880_v8  ;;  %v2888_v20 = vpack.c.bf16 %v249_v18, %v245_v15  ;;  %v252_v21 = vld [vmem:[%s3833_s2 + $0x38] sm:$0xff]  ;;  %v251_v23 = vld [vmem:[%s3833_s2 + $0x30] sm:$0xff]  ;;  %v438_v25 = vld [vmem:[%s3836_s5 + $0x8] sm:$0xff] }
   0x7   :  { %2885 = vmatpush1.bf16.msra.mxu1 %v2884_v12  ;;  %2887 = vmatprep.subr.bf16.mxu0 %v2886_v17  ;;  %v2890_v24 = vpack.c.bf16 %v252_v21, %v248_v19  ;;  %v442_v26 = vld [vmem:[%s3836_s5 + $0x28] sm:$0x3]  ;;  %v2892_v27 = vpack.c.bf16 %v251_v23, %v247_v22  ;;  %vm3357_vm3 = vmpackc.low %vm477_vm1, %vm3219_vm2  ;;  %v440_v30 = vld [vmem:[%s3836_s5 + $0x18] sm:$0xff] }
   0x8   :  { %v3354_v28 = vpack.c.bf16 %v442_v26, %v438_v25  ;;  %v45_v31 = vld [vmem:[%s3831_s0 + $0x8] sm:$0xff]  ;;  %v444_v32 = vld [vmem:[%s3836_s5 + $0x38] sm:$0x3]  ;;  %v437_v34 = vld [vmem:[%s3836_s5] sm:$0xff] }
   0x9   :  { %2693 = vmatmul.mubr.msk.f32.vlgmr.msra.gmra.mrb[0].mxu0 %vm76_vm0, %v44_v16  ;;  %v3373_v33 = vpack.c.bf16 %v444_v32, %v440_v30  ;;  %2891 = vmatprep.subr.bf16.mxu1 %v2890_v24  ;;  %v441_v35 = vld [vmem:[%s3836_s5 + $0x20] sm:$0x3] }
   0xa   :  { %2695 = vmatmul.mubr.msk.f32.vlgmr.msra.gmra.mrb[0].mxu1 %vm76_vm0, %v44_v16  ;;  %2889 = vmatpush1.bf16.msra.mxu0 %v2888_v20 }
   0xb   :  { %153 = vmatprep.mubr.f32.mxu0 %v3218_v7  ;;  %230 = vmatprep.mubr.f32.mxu1 %v3218_v7 }
   0xc   :  { %2896 = vmatprep.subr.msk.bf16.mxu0 %vm3357_vm3, %v3354_v28 }
   0xd   :  { %19 = vsyncpa [#allocation5], 0  ;;  %2694 = vmatmul.mubr.msk.f32.gmra.mrb[2].mxu0 %vm76_vm0, %v45_v31  ;;  %2893 = vmatpush1.bf16.msra.mxu1 %v2892_v27  ;;  %v439_v36 = vld [vmem:[%s3836_s5 + $0x10] sm:$0xff]  ;;  %v3394_v38 = vpack.c.bf16 %v441_v35, %v437_v34  ;;  %v3407_v40 = vld [vmem:[%s3837_s6] sm:$0x3]  ;;  %vm473_vm4 = vcmask 80896   ;;  %v56_v43 = vlaneseq }
   0xe   :  { %v443_v37 = vld [vmem:[%s3836_s5 + $0x30] sm:$0x3]  ;;  %2696 = vmatmul.mubr.msk.f32.gmra.mrb[2].mxu1 %vm76_vm0, %v45_v31  ;;  %339 = vmatprep.mubr.f32.mxu0 %v3218_v7  ;;  %v3412_v41 = vld [vmem:[%s3838_s7] sm:$0x3]  ;;  %vm2145_vm5 = vcmask 1043458   ;;  %vm2152_vm6 = vcmask 1045508  }
   0xf   :  { %416 = vmatprep.mubr.f32.mxu1 %v3218_v7  ;;  %2902 = vmatprep.subr.msk.bf16.mxu1 %vm3357_vm3, %v3373_v33  ;;  %v3399_v39 = vpack.c.bf16 %v443_v37, %v439_v36  ;;  %v447_v42 = vadd.f32 %v3412_v41, %v3407_v40  ;;  %v57_v44 = vshrl.u32 %v56_v43, 7  ;;  %v54_v46 = vld [vmem:[%s3834_s3] sm:$0xf]  ;;  %vm2159_vm7 = vcmask 1047558  }
  0x10   :  { %v253_v61 = vld [vmem:[%s3835_s4] sm:$0xf]  ;;  %vm3222_vm8 = vmmov 0   ;;  %vm2649_vm9 = vcmask 25600  }
  0x11   :  { %2697 = vmatmul.mubr.msk.f32.vlgmr.msra.gmra.mrb[4].mxu0 %vm76_vm0, %v44_v16  ;;  %v58_v45 = vsub.s32 0, %v57_v44  ;;  %v62_v47 = vsub.s32 1, %v57_v44  ;;  %v66_v48 = vsub.s32 2, %v57_v44  ;;  %v70_v50 = vsub.s32 3, %v57_v44 }
  0x12   :  { %2699 = vmatmul.mubr.msk.f32.vlgmr.msra.gmra.mrb[4].mxu1 %vm76_vm0, %v44_v16  ;;  %345 = vmatprep.mubr.f32.mxu0 %v3218_v7 }
  0x13   :  { %422 = vmatprep.mubr.f32.mxu1 %v3218_v7  ;;  %2899 = vmatpush1.bf16.msk.msra.mxu0 %vm3357_vm3, %v3394_v38  ;;  %v59_v49 = vrot.slane %v54_v46, %v58_v45  ;;  %v63_v51 = vrot.slane %v54_v46, %v62_v47  ;;  %v67_v52 = vrot.slane %v54_v46, %v66_v48 }
  0x14   :  { %2905 = vmatpush1.bf16.msk.msra.mxu1 %vm3357_vm3, %v3399_v39  ;;  %2908 = vmatprep.subr.msk.bf16.mxu0 %vm3357_vm3, %v3354_v28  ;;  %v71_v53 = vrot.slane %v54_v46, %v70_v50  ;;  %v258_v2 = vrot.slane %v253_v61, %v58_v45  ;;  %v262_v6 = vrot.slane %v253_v61, %v62_v47 }
  0x15   :  { %2698 = vmatmul.mubr.msk.f32.gmra.mrb[6].mxu0 %vm76_vm0, %v45_v31  ;;  %2914 = vmatprep.subr.msk.bf16.mxu1 %vm3357_vm3, %v3373_v33  ;;  %v266_v11 = vrot.slane %v253_v61, %v66_v48  ;;  %v270_v15 = vrot.slane %v253_v61, %v70_v50 }
  0x16   :  { %2700 = vmatmul.mubr.msk.f32.gmra.mrb[6].mxu1 %vm76_vm0, %v45_v31  ;;  %554 = vmatprep.mubr.f32.mxu0 %v3218_v7 }
  0x17   :  { %625 = vmatprep.mubr.f32.mxu1 %v3218_v7 }
  0x19   :  { %2703 = vmatmul.mubr.msk.f32.vlgmr.msra.gmra.mrb[8].mxu0 %vm473_vm4, %v447_v42 }
  0x1a   :  { %2706 = vmatmul.mubr.msk.f32.vlgmr.msra.gmra.mrb[8].mxu1 %vm473_vm4, %v447_v42  ;;  %2911 = vmatpush1.bf16.msk.msra.mxu0 %vm3357_vm3, %v3394_v38 }
  0x1b   :  { %2917 = vmatpush1.bf16.msk.msra.mxu1 %vm3357_vm3, %v3399_v39  ;;  %751 = vmatprep.mubr.f32.mxu0 %v3218_v7 }
  0x1c   :  { %822 = vmatprep.mubr.f32.mxu1 %v3218_v7  ;;  %2920 = vmatprep.subr.msk.bf16.mxu0 %vm3357_vm3, %v3354_v28 }
  0x1d   :  { %2926 = vmatprep.subr.msk.bf16.mxu1 %vm3357_vm3, %v3373_v33 }
  0xdc   :  { %v149_v54 = vpop.f32.mrb[0].mxu0 }
  0xdd   :  { %v150_v55 = vadd.f32 %v149_v54, %v59_v49  ;;  %v151_v56 = vpop.f32.mrb[1].mxu0  ;;  %v226_v57 = vpop.f32.mrb[0].mxu1 }
  0xde   :  { %v152_v58 = vadd.f32 %v151_v56, %v63_v51  ;;  %v227_v59 = vadd.f32 %v226_v57, %v67_v52  ;;  %v228_v60 = vpop.f32.mrb[1].mxu1 }
  0xdf   :  { %237 = vst [vmem:[#allocation2] sm:$0xff] %v150_v55  ;;  %v229_v62 = vadd.f32 %v228_v60, %v71_v53 }
  0xe0   :  { %238 = vst [vmem:[#allocation2 + $0x8] sm:$0xff] %v152_v58  ;;  %v155_v63 = vpop.f32.mrb[2].mxu0  ;;  %239 = vst [vmem:[#allocation2 + $0x10] sm:$0xff] %v227_v59 }
  0xe1   :  { %v156_v0 = vadd.f32 %v155_v63, %v59_v49  ;;  %v157_v1 = vpop.f32.mrb[3].mxu0  ;;  %240 = vst [vmem:[#allocation2 + $0x18] sm:$0xff] %v229_v62  ;;  %v232_v3 = vpop.f32.mrb[2].mxu1 }
  0xe2   :  { %v158_v4 = vadd.f32 %v157_v1, %v63_v51  ;;  %v233_v5 = vadd.f32 %v232_v3, %v67_v52  ;;  %v234_v8 = vpop.f32.mrb[3].mxu1 }
  0xe3   :  { %241 = vst [vmem:[#allocation2 + $0x20] sm:$0xff] %v156_v0  ;;  %v235_v9 = vadd.f32 %v234_v8, %v71_v53 }
  0xe4   :  { %242 = vst [vmem:[#allocation2 + $0x28] sm:$0xff] %v158_v4  ;;  %v341_v10 = vpop.f32.mrb[4].mxu0  ;;  %243 = vst [vmem:[#allocation2 + $0x30] sm:$0xff] %v233_v5  ;;  %v448_v5 = vld [vmem:[%s3839_s8] sm:$0x3] }
  0xe5   :  { %v342_v12 = vadd.f32 %v341_v10, %v258_v2  ;;  %v343_v13 = vpop.f32.mrb[5].mxu0  ;;  %244 = vst [vmem:[#allocation2 + $0x38] sm:$0xff] %v235_v9  ;;  %v418_v14 = vpop.f32.mrb[4].mxu1 }
  0xe6   :  { %v344_v16 = vadd.f32 %v343_v13, %v262_v6  ;;  %v419_v17 = vadd.f32 %v418_v14, %v266_v11  ;;  %v420_v18 = vpop.f32.mrb[5].mxu1  ;;  %v449_v44 = vld [vmem:[#allocation2] sm:$0x3] }
  0xe7   :  { %429 = vst [vmem:[#allocation3] sm:$0xff] %v342_v12  ;;  %v421_v19 = vadd.f32 %v420_v18, %v270_v15  ;;  %v450_v47 = vld [vmem:[#allocation2 + $0x8] sm:$0x3]  ;;  %v451_v51 = vld [vmem:[#allocation2 + $0x10] sm:$0x3] }
  0xe8   :  { %430 = vst [vmem:[#allocation3 + $0x8] sm:$0xff] %v344_v16  ;;  %431 = vst [vmem:[#allocation3 + $0x10] sm:$0xff] %v419_v17  ;;  %v347_v20 = vpop.f32.mrb[6].mxu0  ;;  %v452_v58 = vld [vmem:[#allocation2 + $0x18] sm:$0x3] }
  0xe9   :  { %v348_v21 = vadd.f32 %v347_v20, %v258_v2  ;;  %432 = vst [vmem:[#allocation3 + $0x18] sm:$0xff] %v421_v19  ;;  %v349_v22 = vpop.f32.mrb[7].mxu0  ;;  %v424_v23 = vpop.f32.mrb[6].mxu1 }
  0xea   :  { %v350_v24 = vadd.f32 %v349_v22, %v262_v6  ;;  %v425_v25 = vadd.f32 %v424_v23, %v266_v11  ;;  %v426_v26 = vpop.f32.mrb[7].mxu1  ;;  %v660_v22 = vld [vmem:[#allocation2] sm:$0xc] }
  0xeb   :  { %433 = vst [vmem:[#allocation3 + $0x20] sm:$0xff] %v348_v21  ;;  %v427_v27 = vadd.f32 %v426_v26, %v270_v15 }
  0xec   :  { %434 = vst [vmem:[#allocation3 + $0x28] sm:$0xff] %v350_v24  ;;  %435 = vst [vmem:[#allocation3 + $0x30] sm:$0xff] %v425_v25  ;;  %v556_v30 = vpop.f32.mrb[8].mxu0 }
  0xed   :  { %436 = vst [vmem:[#allocation3 + $0x38] sm:$0xff] %v427_v27  ;;  %v558_v31 = vpop.f32.mrb[9].mxu0  ;;  %v627_v32 = vpop.f32.mrb[8].mxu1  ;;  %v661_v27 = vld [vmem:[#allocation2 + $0x8] sm:$0xc] }
  0xee   :  { %v629_v34 = vpop.f32.mrb[9].mxu1 }
  0xf2   :  { %v453_v35 = vld [vmem:[#allocation3 + $0x20] sm:$0xc0]  ;;  %v664_v18 = vld [vmem:[#allocation3 + $0x20] sm:$0x30] }
  0xf3   :  { %v461_v36 = vrot.slane %v453_v35, 6  ;;  %v454_v37 = vld [vmem:[#allocation3 + $0x28] sm:$0xc0]  ;;  %v455_v42 = vld [vmem:[#allocation3 + $0x30] sm:$0xc0]  ;;  %v672_v20 = vrot.slane %v664_v18, 2 }
  0xf4   :  { %v462_v45 = vrot.slane %v454_v37, 6  ;;  %v463_v49 = vrot.slane %v455_v42, 6  ;;  %v456_v53 = vld [vmem:[#allocation3 + $0x38] sm:$0xc0]  ;;  %v665_v19 = vld [vmem:[#allocation3 + $0x28] sm:$0x30] }
  0xf5   :  { %v469_v46 = vadd.f32 %v461_v36, %v449_v44  ;;  %v464_v57 = vrot.slane %v456_v53, 6  ;;  %v673_v21 = vrot.slane %v665_v19, 2  ;;  %v680_v25 = vadd.f32 %v672_v20, %v660_v22  ;;  %v872_v19 = vld [vmem:[#allocation2] sm:$0x30] }
  0xf6   :  { %v470_v48 = vadd.f32 %v462_v45, %v450_v47  ;;  %v471_v56 = vadd.f32 %v463_v49, %v451_v51  ;;  %v667_v45 = vld [vmem:[#allocation3 + $0x38] sm:$0x30]  ;;  %v663_v51 = vld [vmem:[#allocation2 + $0x18] sm:$0xc] }
  0xf7   :  { %v632_v50 = vadd.f32 %v556_v30, %v469_v46  ;;  %v472_v60 = vadd.f32 %v464_v57, %v452_v58  ;;  %v662_v46 = vld [vmem:[#allocation2 + $0x10] sm:$0xc]  ;;  %v675_v49 = vrot.slane %v667_v45, 2 }
  0xf8   :  { %v633_v52 = vadd.f32 %v558_v31, %v470_v48  ;;  %v634_v59 = vadd.f32 %v627_v32, %v471_v56  ;;  %v666_v32 = vld [vmem:[#allocation3 + $0x30] sm:$0x30] }
  0xf9   :  { %v2707_v54 = vmul.f32 -1.442695, %v632_v50  ;;  %v635_v62 = vadd.f32 %v629_v34, %v472_v60  ;;  %v681_v34 = vadd.f32 %v673_v21, %v661_v27  ;;  %v674_v44 = vrot.slane %v666_v32, 2  ;;  %v878_v27 = vld [vmem:[#allocation3 + $0x30] sm:$0xc] }
  0xfa   :  { %v2708_v55 = vmul.f32 -1.442695, %v633_v52  ;;  %v2709_v61 = vmul.f32 -1.442695, %v634_v59 }
  0xfb   :  { %3046 = vpow2.f32 %v2707_v54  ;;  %v682_v50 = vadd.f32 %v674_v44, %v662_v46  ;;  %v683_v54 = vadd.f32 %v675_v49, %v663_v51 }
  0xfc   :  { %3048 = vpow2.f32 %v2708_v55 }
  0xfd   :  { %3050 = vpow2.f32 %v2709_v61 }
  0xfe   :  { %3052 = vtanh.f32 %v635_v62 }
 0x105   :  { %v3047_v63 = vpop.eup %3046 }
 0x106   :  { %v3049_v0 = vpop.eup %3048  ;;  %v645_v1 = vadd.f32 1.0, %v3047_v63 }
 0x107   :  { %v646_v2 = vadd.f32 1.0, %v3049_v0  ;;  %v3051_v3 = vpop.eup %3050 }
 0x108   :  { %3054 = vrcp.f32 %v645_v1  ;;  %v3053_v4 = vpop.eup %3052  ;;  %v647_v9 = vadd.f32 1.0, %v3051_v3 }
 0x109   :  { %3056 = vrcp.f32 %v646_v2 }
 0x10a   :  { %3058 = vrcp.f32 %v647_v9 }
 0x112   :  { %v3055_v6 = vpop.eup %3054 }
 0x113   :  { %v3057_v8 = vpop.eup %3056  ;;  %v656_v10 = vmul.f32 %v3055_v6, %v3053_v4 }
 0x114   :  { %v655_v11 = vmul.f32 %v3057_v8, %v448_v5  ;;  %v3059_v13 = vpop.eup %3058  ;;  %v2142_v8 = vrot.slane %v3407_v40, 6 }
 0x116   :  { %v3459_v12 = vadd.f32 %v656_v10, %v655_v11 }
 0x118   :  { %3060 = vtanh.f32 %v3459_v12  ;;  %v865_v0 = vrot.slane %v3459_v12, 6 }
 0x122   :  { %v3061_v14 = vpop.eup %3060 }
 0x123   :  { %v3462_v15 = vmul.f32 %v3061_v14, %v3059_v13  ;;  %v876_v14 = vld [vmem:[#allocation3 + $0x20] sm:$0xc] }
 0x125   :  { %2712 = vmatmul.mubr.msk.f32.vlgmr.msra.gmra.mrb[10].mxu0 %vm473_vm4, %v3462_v15  ;;  %2715 = vmatmul.mubr.msk.f32.vlgmr.msra.gmra.mrb[10].mxu1 %vm473_vm4, %v3462_v15  ;;  %v2137_v16 = vmul.f32 %v3462_v15, %v3407_v40 }
 0x126   :  { %2923 = vmatpush1.bf16.msk.msra.mxu0 %vm3357_vm3, %v3394_v38  ;;  %2929 = vmatpush1.bf16.msk.msra.mxu1 %vm3357_vm3, %v3399_v39 }
 0x127   :  { %v2138_v17 = vsel %vm477_vm1, %v2137_v16, 0.0  ;;  %964 = vmatprep.mubr.f32.mxu0 %v3218_v7  ;;  %1035 = vmatprep.mubr.f32.mxu1 %v3218_v7  ;;  %v877_v16 = vld [vmem:[#allocation3 + $0x28] sm:$0xc] }
 0x128   :  { %2139 = vadd.xlane.f32.xlu0 %v2138_v17  ;;  %2932 = vmatprep.subr.msk.bf16.mxu0 %vm3357_vm3, %v3354_v28  ;;  %v884_v17 = vrot.slane %v876_v14, 6  ;;  %v885_v18 = vrot.slane %v877_v16, 6 }
 0x129   :  { %2938 = vmatprep.subr.msk.bf16.mxu1 %vm3357_vm3, %v3373_v33 }
 0x12a   :  { %v892_v22 = vadd.f32 %v884_v17, %v872_v19  ;;  %v1089_v17 = vld [vmem:[#allocation3 + $0x20] sm:$0x3] }
 0x12b   :  { %v1097_v19 = vrot.slane %v1089_v17, 2  ;;  %v2196_v17 = vrot.slane %v3412_v41, 2 }
 0x1f8   :  { %v753_v23 = vpop.f32.mrb[10].mxu0  ;;  %v824_v24 = vpop.f32.mrb[10].mxu1 }
 0x1f9   :  { %v833_v26 = vrot.slane %v753_v23, 6  ;;  %v755_v30 = vpop.f32.mrb[11].mxu0  ;;  %v826_v31 = vpop.f32.mrb[11].mxu1  ;;  %v835_v48 = vrot.slane %v824_v24, 6  ;;  %v873_v24 = vld [vmem:[#allocation2 + $0x8] sm:$0x30] }
 0x1fa   :  { %v834_v35 = vrot.slane %v755_v30, 6  ;;  %v836_v52 = vrot.slane %v826_v31, 6  ;;  %v893_v30 = vadd.f32 %v885_v18, %v873_v24  ;;  %v1090_v18 = vld [vmem:[#allocation3 + $0x28] sm:$0x3] }
 0x1fb   :  { %v841_v36 = vadd.f32 %v833_v26, %v680_v25  ;;  %v843_v53 = vadd.f32 %v835_v48, %v682_v50  ;;  %v875_v48 = vld [vmem:[#allocation2 + $0x18] sm:$0x30] }
 0x1fc   :  { %v842_v37 = vadd.f32 %v834_v35, %v681_v34  ;;  %v844_v55 = vadd.f32 %v836_v52, %v683_v54 }
 0x1fd   :  { %v2716_v42 = vmul.f32 -1.442695, %v841_v36  ;;  %v2718_v56 = vmul.f32 -1.442695, %v843_v53  ;;  %v886_v36 = vrot.slane %v878_v27, 6 }
 0x1fe   :  { %v2717_v47 = vmul.f32 -1.442695, %v842_v37  ;;  %v879_v37 = vld [vmem:[#allocation3 + $0x38] sm:$0xc] }
 0x1ff   :  { %3062 = vpow2.f32 %v2716_v42  ;;  %v874_v42 = vld [vmem:[#allocation2 + $0x10] sm:$0x30]  ;;  %v887_v46 = vrot.slane %v879_v37, 6 }
 0x200   :  { %3064 = vpow2.f32 %v2717_v47  ;;  %v894_v47 = vadd.f32 %v886_v36, %v874_v42 }
 0x201   :  { %3066 = vtanh.f32 %v844_v55  ;;  %v895_v51 = vadd.f32 %v887_v46, %v875_v48 }
 0x202   :  { %3068 = vpow2.f32 %v2718_v56 }
 0x209   :  { %v3063_v57 = vpop.eup %3062 }
 0x20a   :  { %v854_v58 = vadd.f32 1.0, %v3063_v57  ;;  %v3065_v59 = vpop.eup %3064 }
 0x20b   :  { %v855_v60 = vadd.f32 1.0, %v3065_v59  ;;  %v3067_v61 = vpop.eup %3066 }
 0x20c   :  { %3070 = vrcp.f32 %v854_v58  ;;  %v3069_v62 = vpop.eup %3068 }
 0x20d   :  { %3072 = vrcp.f32 %v855_v60  ;;  %v856_v3 = vadd.f32 1.0, %v3069_v62 }
 0x20f   :  { %3074 = vrcp.f32 %v856_v3 }
 0x216   :  { %v3071_v63 = vpop.eup %3070 }
 0x217   :  { %v868_v1 = vmul.f32 %v3071_v63, %v3067_v61  ;;  %v3073_v2 = vpop.eup %3072 }
 0x218   :  { %v867_v4 = vmul.f32 %v3073_v2, %v865_v0 }
 0x219   :  { %v3075_v6 = vpop.eup %3074 }
 0x21a   :  { %v3486_v5 = vadd.f32 %v868_v1, %v867_v4  ;;  %v2190_v4 = vrot.slane %v3412_v41, 4 }
 0x21c   :  { %3076 = vtanh.f32 %v3486_v5  ;;  %v1078_v61 = vrot.slane %v3486_v5, 6 }
 0x226   :  { %v3077_v9 = vpop.eup %3076 }
 0x227   :  { %v3490_v10 = vmul.f32 %v3077_v9, %v3075_v6  ;;  %v2149_v6 = vrot.slane %v3407_v40, 4 }
 0x229   :  { %v897_v11 = vrot.slane %v3490_v10, 2  ;;  %v2144_v12 = vmul.f32 %v2142_v8, %v3490_v10 }
 0x22b   :  { %2721 = vmatmul.mubr.msk.f32.vlgmr.msra.gmra.mrb[12].mxu0 %vm473_vm4, %v897_v11  ;;  %2724 = vmatmul.mubr.msk.f32.vlgmr.msra.gmra.mrb[12].mxu1 %vm473_vm4, %v897_v11  ;;  %v2146_v13 = vsel %vm2145_vm5, %v2144_v12, 0.0 }
 0x22c   :  { %2147 = vadd.xlane.f32.xlu0 %v2146_v13  ;;  %2935 = vmatpush1.bf16.msk.msra.mxu0 %vm3357_vm3, %v3394_v38 }
 0x22d   :  { %2941 = vmatpush1.bf16.msk.msra.mxu1 %vm3357_vm3, %v3399_v39  ;;  %1177 = vmatprep.mubr.f32.mxu0 %v3218_v7 }
 0x22e   :  { %1248 = vmatprep.mubr.f32.mxu1 %v3218_v7  ;;  %2944 = vmatprep.subr.msk.bf16.mxu0 %vm3357_vm3, %v3354_v28 }
 0x22f   :  { %2950 = vmatprep.subr.msk.bf16.mxu1 %vm3357_vm3, %v3373_v33 }
 0x2fe   :  { %v966_v20 = vpop.f32.mrb[12].mxu0  ;;  %v1037_v21 = vpop.f32.mrb[12].mxu1 }
 0x2ff   :  { %v1046_v23 = vrot.slane %v966_v20, 4  ;;  %v968_v25 = vpop.f32.mrb[13].mxu0  ;;  %v1039_v26 = vpop.f32.mrb[13].mxu1  ;;  %v1048_v45 = vrot.slane %v1037_v21, 4  ;;  %v1098_v20 = vrot.slane %v1090_v18, 2 }
 0x300   :  { %v1047_v31 = vrot.slane %v968_v25, 4  ;;  %v1049_v49 = vrot.slane %v1039_v26, 4  ;;  %v1085_v21 = vld [vmem:[#allocation2] sm:$0xc0]  ;;  %v1086_v26 = vld [vmem:[#allocation2 + $0x8] sm:$0xc0] }
 0x301   :  { %v1054_v32 = vadd.f32 %v1046_v23, %v892_v22  ;;  %v1056_v50 = vadd.f32 %v1048_v45, %v894_v47  ;;  %v1105_v24 = vadd.f32 %v1097_v19, %v1085_v21  ;;  %v1087_v45 = vld [vmem:[#allocation2 + $0x10] sm:$0xc0] }
 0x302   :  { %v1055_v34 = vadd.f32 %v1047_v31, %v893_v30  ;;  %v1057_v52 = vadd.f32 %v1049_v49, %v895_v51  ;;  %v1091_v31 = vld [vmem:[#allocation3 + $0x30] sm:$0x3] }
 0x303   :  { %v2725_v35 = vmul.f32 -1.442695, %v1054_v32  ;;  %v2727_v53 = vmul.f32 -1.442695, %v1056_v50  ;;  %v1106_v32 = vadd.f32 %v1098_v20, %v1086_v26  ;;  %v1099_v42 = vrot.slane %v1091_v31, 2 }
 0x304   :  { %v2726_v44 = vmul.f32 -1.442695, %v1055_v34  ;;  %v1088_v50 = vld [vmem:[#allocation2 + $0x18] sm:$0xc0]  ;;  %v1298_v26 = vld [vmem:[#allocation2 + $0x20] sm:$0x3] }
 0x305   :  { %3078 = vpow2.f32 %v2725_v35  ;;  %v1107_v49 = vadd.f32 %v1099_v42, %v1087_v45 }
 0x306   :  { %3080 = vpow2.f32 %v2726_v44  ;;  %v1092_v44 = vld [vmem:[#allocation3 + $0x38] sm:$0x3] }
 0x307   :  { %3082 = vtanh.f32 %v1057_v52  ;;  %v1100_v48 = vrot.slane %v1092_v44, 2 }
 0x308   :  { %3084 = vpow2.f32 %v2727_v53 }
 0x309   :  { %v1108_v53 = vadd.f32 %v1100_v48, %v1088_v50  ;;  %v1300_v48 = vld [vmem:[#allocation2 + $0x30] sm:$0x3] }
 0x30f   :  { %v3079_v54 = vpop.eup %3078 }
 0x310   :  { %v1067_v55 = vadd.f32 1.0, %v3079_v54  ;;  %v3081_v56 = vpop.eup %3080 }
 0x311   :  { %v1068_v57 = vadd.f32 1.0, %v3081_v56  ;;  %v3083_v58 = vpop.eup %3082 }
 0x312   :  { %3086 = vrcp.f32 %v1067_v55  ;;  %v3085_v59 = vpop.eup %3084 }
 0x313   :  { %3088 = vrcp.f32 %v1068_v57  ;;  %v1069_v0 = vadd.f32 1.0, %v3085_v59 }
 0x315   :  { %3090 = vrcp.f32 %v1069_v0 }
 0x31c   :  { %v3087_v60 = vpop.eup %3086 }
 0x31d   :  { %v1081_v62 = vmul.f32 %v3087_v60, %v3083_v58  ;;  %v3089_v63 = vpop.eup %3088 }
 0x31e   :  { %v1080_v1 = vmul.f32 %v3089_v63, %v1078_v61 }
 0x31f   :  { %v3091_v3 = vpop.eup %3090 }
 0x320   :  { %v3514_v2 = vadd.f32 %v1081_v62, %v1080_v1 }
 0x322   :  { %3092 = vtanh.f32 %v3514_v2  ;;  %v1291_v63 = vrot.slane %v3514_v2, 6 }
 0x32c   :  { %v3093_v9 = vpop.eup %3092 }
 0x32d   :  { %v3519_v11 = vmul.f32 %v3093_v9, %v3091_v3 }
 0x32f   :  { %v1110_v5 = vrot.slane %v3519_v11, 4  ;;  %v2192_v12 = vmul.f32 %v2190_v4, %v3519_v11  ;;  %v2151_v13 = vmul.f32 %v2149_v6, %v3519_v11 }
 0x331   :  { %2730 = vmatmul.mubr.msk.f32.vlgmr.msra.gmra.mrb[14].mxu0 %vm473_vm4, %v1110_v5  ;;  %2733 = vmatmul.mubr.msk.f32.vlgmr.msra.gmra.mrb[14].mxu1 %vm473_vm4, %v1110_v5  ;;  %v2193_v14 = vsel %vm2152_vm6, %v2192_v12, 0.0  ;;  %v2153_v16 = vsel %vm2152_vm6, %v2151_v13, 0.0  ;;  %v2156_v13 = vrot.slane %v3407_v40, 2  ;;  %v2469_v40 = vld [vmem:[%s3840_s9] sm:$0xff] }
 0x332   :  { %2194 = vadd.xlane.f32.xlu0 %v2193_v14  ;;  %2154 = vadd.xlane.f32.xlu1 %v2153_v16 }
 0x333   :  { %2947 = vmatpush1.bf16.msk.msra.mxu0 %vm3357_vm3, %v3394_v38  ;;  %2953 = vmatpush1.bf16.msk.msra.mxu1 %vm3357_vm3, %v3399_v39 }
 0x334   :  { %1390 = vmatprep.mubr.f32.mxu0 %v3218_v7  ;;  %1461 = vmatprep.mubr.f32.mxu1 %v3218_v7 }
 0x335   :  { %2956 = vmatprep.subr.msk.bf16.mxu0 %vm3357_vm3, %v3354_v28  ;;  %2962 = vmatprep.subr.msk.bf16.mxu1 %vm3357_vm3, %v3373_v33 }
 0x404   :  { %v1179_v22 = vpop.f32.mrb[14].mxu0  ;;  %v1250_v23 = vpop.f32.mrb[14].mxu1 }
 0x405   :  { %v1259_v25 = vrot.slane %v1179_v22, 2  ;;  %v1181_v27 = vpop.f32.mrb[15].mxu0  ;;  %v1252_v30 = vpop.f32.mrb[15].mxu1  ;;  %v1261_v47 = vrot.slane %v1250_v23, 2  ;;  %v1302_v22 = vld [vmem:[#allocation3] sm:$0xc0] }
 0x406   :  { %v1260_v34 = vrot.slane %v1181_v27, 2  ;;  %v1262_v51 = vrot.slane %v1252_v30, 2  ;;  %v1303_v23 = vld [vmem:[#allocation3 + $0x8] sm:$0xc0]  ;;  %v1299_v30 = vld [vmem:[#allocation2 + $0x28] sm:$0x3] }
 0x407   :  { %v1267_v35 = vadd.f32 %v1259_v25, %v1105_v24  ;;  %v1269_v52 = vadd.f32 %v1261_v47, %v1107_v49  ;;  %v1310_v24 = vrot.slane %v1302_v22, 6  ;;  %v1311_v25 = vrot.slane %v1303_v23, 6  ;;  %v1305_v47 = vld [vmem:[#allocation3 + $0x18] sm:$0xc0]  ;;  %v1503_v22 = vld [vmem:[#allocation3] sm:$0x30] }
 0x408   :  { %v1268_v36 = vadd.f32 %v1260_v34, %v1106_v32  ;;  %v1270_v54 = vadd.f32 %v1262_v51, %v1108_v53  ;;  %v1304_v32 = vld [vmem:[#allocation3 + $0x10] sm:$0xc0]  ;;  %v1313_v50 = vrot.slane %v1305_v47, 6  ;;  %v1504_v23 = vld [vmem:[#allocation3 + $0x8] sm:$0x30] }
 0x409   :  { %v2734_v37 = vmul.f32 -1.442695, %v1267_v35  ;;  %v2736_v55 = vmul.f32 -1.442695, %v1269_v52  ;;  %v1318_v27 = vadd.f32 %v1310_v24, %v1298_v26  ;;  %v1319_v35 = vadd.f32 %v1311_v25, %v1299_v30  ;;  %v1301_v52 = vld [vmem:[#allocation2 + $0x38] sm:$0x3] }
 0x40a   :  { %v2735_v46 = vmul.f32 -1.442695, %v1268_v36  ;;  %v1511_v24 = vrot.slane %v1503_v22, 2  ;;  %v1512_v25 = vrot.slane %v1504_v23, 2  ;;  %v1499_v26 = vld [vmem:[#allocation2 + $0x20] sm:$0xc] }
 0x40b   :  { %3094 = vpow2.f32 %v2734_v37 }
 0x40c   :  { %3096 = vpow2.f32 %v2735_v46  ;;  %v1312_v46 = vrot.slane %v1304_v32, 6 }
 0x40d   :  { %3098 = vtanh.f32 %v1270_v54  ;;  %v1321_v54 = vadd.f32 %v1313_v50, %v1301_v52 }
 0x40e   :  { %3100 = vpow2.f32 %v2736_v55  ;;  %v1320_v51 = vadd.f32 %v1312_v46, %v1300_v48  ;;  %v1501_v48 = vld [vmem:[#allocation2 + $0x30] sm:$0xc] }
 0x415   :  { %v3095_v56 = vpop.eup %3094 }
 0x416   :  { %v1280_v57 = vadd.f32 1.0, %v3095_v56  ;;  %v3097_v58 = vpop.eup %3096 }
 0x417   :  { %v1281_v59 = vadd.f32 1.0, %v3097_v58  ;;  %v3099_v60 = vpop.eup %3098 }
 0x418   :  { %3102 = vrcp.f32 %v1280_v57  ;;  %v3101_v61 = vpop.eup %3100 }
 0x419   :  { %3104 = vrcp.f32 %v1281_v59  ;;  %v1282_v3 = vadd.f32 1.0, %v3101_v61 }
 0x41b   :  { %3106 = vrcp.f32 %v1282_v3 }
 0x422   :  { %v3103_v62 = vpop.eup %3102 }
 0x423   :  { %v1294_v0 = vmul.f32 %v3103_v62, %v3099_v60  ;;  %v3105_v1 = vpop.eup %3104 }
 0x424   :  { %v1293_v9 = vmul.f32 %v3105_v1, %v1291_v63 }
 0x425   :  { %v3107_v12 = vpop.eup %3106 }
 0x426   :  { %v3547_v5 = vadd.f32 %v1294_v0, %v1293_v9 }
 0x428   :  { %3108 = vtanh.f32 %v3547_v5  ;;  %v1492_v0 = vrot.slane %v3547_v5, 6 }
 0x432   :  { %v3109_v14 = vpop.eup %3108 }
 0x433   :  { %v3551_v16 = vmul.f32 %v3109_v14, %v3107_v12 }
 0x435   :  { %v3555_v2 = vrot.slane %v3551_v16, 6  ;;  %v2158_v18 = vmul.f32 %v2156_v13, %v3551_v16  ;;  %v2198_v20 = vmul.f32 %v2196_v17, %v3551_v16 }
 0x437   :  { %2739 = vmatmul.mubr.msk.f32.vlgmr.msra.gmra.mrb[16].mxu0 %vm473_vm4, %v3555_v2  ;;  %2742 = vmatmul.mubr.msk.f32.vlgmr.msra.gmra.mrb[16].mxu1 %vm473_vm4, %v3555_v2  ;;  %v2160_v19 = vsel %vm2159_vm7, %v2158_v18, 0.0  ;;  %v2199_v21 = vsel %vm2159_vm7, %v2198_v20, 0.0 }
 0x438   :  { %2161 = vadd.xlane.f32.xlu1 %v2160_v19  ;;  %2959 = vmatpush1.bf16.msk.msra.mxu0 %vm3357_vm3, %v3394_v38 }
 0x439   :  { %2965 = vmatpush1.bf16.msk.msra.mxu1 %vm3357_vm3, %v3399_v39  ;;  %1590 = vmatprep.mubr.f32.mxu0 %v3218_v7 }
 0x43a   :  { %1661 = vmatprep.mubr.f32.mxu1 %v3218_v7  ;;  %2968 = vmatprep.subr.msk.bf16.mxu0 %vm3357_vm3, %v3354_v28 }
 0x43b   :  { %2974 = vmatprep.subr.msk.bf16.mxu1 %vm3357_vm3, %v3373_v33 }
 0x43c   :  { %2200 = vadd.xlane.f32.xlu1 %v2199_v21 }
 0x50a   :  { %v1392_v31 = vpop.f32.mrb[16].mxu0  ;;  %v1463_v34 = vpop.f32.mrb[16].mxu1 }
 0x50b   :  { %v1468_v36 = vadd.f32 %v1392_v31, %v1318_v27  ;;  %v1394_v37 = vpop.f32.mrb[17].mxu0  ;;  %v1465_v42 = vpop.f32.mrb[17].mxu1  ;;  %v1470_v53 = vadd.f32 %v1463_v34, %v1320_v51  ;;  %v1519_v31 = vadd.f32 %v1511_v24, %v1499_v26  ;;  %v1500_v34 = vld [vmem:[#allocation2 + $0x28] sm:$0xc]  ;;  %v2184_v24 = vrot.slane %v3412_v41, 6 }
 0x50c   :  { %v1469_v44 = vadd.f32 %v1394_v37, %v1319_v35  ;;  %v1471_v55 = vadd.f32 %v1465_v42, %v1321_v54  ;;  %v1505_v37 = vld [vmem:[#allocation3 + $0x10] sm:$0x30]  ;;  %v1520_v42 = vadd.f32 %v1512_v25, %v1500_v34  ;;  %v1711_v34 = vld [vmem:[#allocation2 + $0x20] sm:$0x30] }
 0x50d   :  { %v2743_v45 = vmul.f32 -1.442695, %v1468_v36  ;;  %v2745_v56 = vmul.f32 -1.442695, %v1470_v53  ;;  %v1513_v47 = vrot.slane %v1505_v37, 2 }
 0x50e   :  { %v2744_v49 = vmul.f32 -1.442695, %v1469_v44  ;;  %v1502_v53 = vld [vmem:[#allocation2 + $0x38] sm:$0xc] }
 0x50f   :  { %3110 = vpow2.f32 %v2743_v45  ;;  %v1521_v52 = vadd.f32 %v1513_v47, %v1501_v48 }
 0x510   :  { %3112 = vpow2.f32 %v2744_v49 }
 0x511   :  { %3114 = vtanh.f32 %v1471_v55 }
 0x512   :  { %3116 = vpow2.f32 %v2745_v56 }
 0x519   :  { %v3111_v57 = vpop.eup %3110 }
 0x51a   :  { %v1481_v58 = vadd.f32 1.0, %v3111_v57  ;;  %v3113_v59 = vpop.eup %3112 }
 0x51b   :  { %v1482_v60 = vadd.f32 1.0, %v3113_v59  ;;  %v3115_v61 = vpop.eup %3114 }
 0x51c   :  { %3118 = vrcp.f32 %v1481_v58  ;;  %v3117_v62 = vpop.eup %3116 }
 0x51d   :  { %3120 = vrcp.f32 %v1482_v60  ;;  %v1483_v9 = vadd.f32 1.0, %v3117_v62 }
 0x51f   :  { %3122 = vrcp.f32 %v1483_v9 }
 0x526   :  { %v3119_v63 = vpop.eup %3118 }
 0x527   :  { %v1495_v1 = vmul.f32 %v3119_v63, %v3115_v61  ;;  %v3121_v3 = vpop.eup %3120 }
 0x528   :  { %v1494_v12 = vmul.f32 %v3121_v3, %v1492_v0 }
 0x529   :  { %v3123_v18 = vpop.eup %3122 }
 0x52a   :  { %v3584_v14 = vadd.f32 %v1495_v1, %v1494_v12 }
 0x52c   :  { %3124 = vtanh.f32 %v3584_v14  ;;  %v1704_v3 = vrot.slane %v3584_v14, 6 }
 0x536   :  { %v3125_v19 = vpop.eup %3124 }
 0x537   :  { %v3587_v20 = vmul.f32 %v3125_v19, %v3123_v18 }
 0x539   :  { %2748 = vmatmul.mubr.msk.f32.vlgmr.msra.gmra.mrb[18].mxu0 %vm473_vm4, %v3587_v20  ;;  %2751 = vmatmul.mubr.msk.f32.vlgmr.msra.gmra.mrb[18].mxu1 %vm473_vm4, %v3587_v20  ;;  %v2202_v5 = vmul.f32 %v3587_v20, %v3412_v41 }
 0x53a   :  { %2971 = vmatpush1.bf16.msk.msra.mxu0 %vm3357_vm3, %v3394_v38  ;;  %2977 = vmatpush1.bf16.msk.msra.mxu1 %vm3357_vm3, %v3399_v39 }
 0x53b   :  { %v2203_v21 = vsel %vm477_vm1, %v2202_v5, 0.0  ;;  %1803 = vmatprep.mubr.f32.mxu0 %v3218_v7  ;;  %1874 = vmatprep.mubr.f32.mxu1 %v3218_v7 }
 0x53c   :  { %2204 = vadd.xlane.f32.xlu0 %v2203_v21  ;;  %2980 = vmatprep.subr.msk.bf16.mxu0 %vm3357_vm3, %v3354_v28 }
 0x53d   :  { %2986 = vmatprep.subr.msk.bf16.mxu1 %vm3357_vm3, %v3373_v33  ;;  %v1506_v33 = vld [vmem:[#allocation3 + $0x18] sm:$0x30] }
 0x53e   :  { %v1514_v51 = vrot.slane %v1506_v33, 2 }
 0x540   :  { %v1522_v56 = vadd.f32 %v1514_v51, %v1502_v53 }
 0x60c   :  { %v1592_v27 = vpop.f32.mrb[18].mxu0  ;;  %v1663_v30 = vpop.f32.mrb[18].mxu1 }
 0x60d   :  { %v1672_v32 = vrot.slane %v1592_v27, 6  ;;  %v1594_v35 = vpop.f32.mrb[19].mxu0  ;;  %v1665_v36 = vpop.f32.mrb[19].mxu1  ;;  %v1674_v50 = vrot.slane %v1663_v30, 6  ;;  %v1715_v27 = vld [vmem:[#allocation3] sm:$0xc] }
 0x60e   :  { %v1673_v44 = vrot.slane %v1594_v35, 6  ;;  %v1675_v54 = vrot.slane %v1665_v36, 6  ;;  %v1716_v30 = vld [vmem:[#allocation3 + $0x8] sm:$0xc] }
 0x60f   :  { %v1680_v28 = vadd.f32 %v1672_v32, %v1519_v31  ;;  %v1682_v55 = vadd.f32 %v1674_v50, %v1521_v52  ;;  %v1723_v31 = vrot.slane %v1715_v27, 6  ;;  %v1724_v32 = vrot.slane %v1716_v30, 6  ;;  %v1713_v50 = vld [vmem:[#allocation2 + $0x30] sm:$0x30] }
 0x610   :  { %v1681_v45 = vadd.f32 %v1673_v44, %v1520_v42  ;;  %v1683_v57 = vadd.f32 %v1675_v54, %v1522_v56  ;;  %v1712_v44 = vld [vmem:[#allocation2 + $0x28] sm:$0x30] }
 0x611   :  { %v2752_v46 = vmul.f32 -1.442695, %v1680_v28  ;;  %v2754_v58 = vmul.f32 -1.442695, %v1682_v55  ;;  %v1731_v37 = vadd.f32 %v1723_v31, %v1711_v34  ;;  %v1714_v55 = vld [vmem:[#allocation2 + $0x38] sm:$0x30] }
 0x612   :  { %v2753_v49 = vmul.f32 -1.442695, %v1681_v45  ;;  %v1717_v45 = vld [vmem:[#allocation3 + $0x10] sm:$0xc] }
 0x613   :  { %3126 = vpow2.f32 %v2752_v46  ;;  %v1732_v46 = vadd.f32 %v1724_v32, %v1712_v44  ;;  %v1725_v48 = vrot.slane %v1717_v45, 6  ;;  %v3192_v32 = vld [vmem:[%s3837_s6] sm:$0x3] }
 0x614   :  { %3128 = vpow2.f32 %v2753_v49  ;;  %v1718_v49 = vld [vmem:[#allocation3 + $0x18] sm:$0xc]  ;;  %v2163_v34 = vmul.f32 %v3192_v32, %v3587_v20 }
 0x615   :  { %3130 = vtanh.f32 %v1683_v57  ;;  %v1726_v53 = vrot.slane %v1718_v49, 6  ;;  %v1733_v54 = vadd.f32 %v1725_v48, %v1713_v50  ;;  %v1925_v48 = vld [vmem:[#allocation2 + $0x28] sm:$0xc0] }
 0x616   :  { %3132 = vpow2.f32 %v2754_v58 }
 0x617   :  { %v1734_v58 = vadd.f32 %v1726_v53, %v1714_v55 }
 0x61d   :  { %v3127_v59 = vpop.eup %3126 }
 0x61e   :  { %v1693_v60 = vadd.f32 1.0, %v3127_v59  ;;  %v3129_v61 = vpop.eup %3128 }
 0x61f   :  { %v1694_v62 = vadd.f32 1.0, %v3129_v61  ;;  %v3131_v63 = vpop.eup %3130 }
 0x620   :  { %3134 = vrcp.f32 %v1693_v60  ;;  %v3133_v0 = vpop.eup %3132 }
 0x621   :  { %3136 = vrcp.f32 %v1694_v62  ;;  %v1695_v18 = vadd.f32 1.0, %v3133_v0 }
 0x623   :  { %3138 = vrcp.f32 %v1695_v18 }
 0x62a   :  { %v3135_v1 = vpop.eup %3134 }
 0x62b   :  { %v1707_v9 = vmul.f32 %v3135_v1, %v3131_v63  ;;  %v3137_v12 = vpop.eup %3136 }
 0x62c   :  { %v1706_v19 = vmul.f32 %v3137_v12, %v1704_v3 }
 0x62d   :  { %v3139_v21 = vpop.eup %3138 }
 0x62e   :  { %v3611_v5 = vadd.f32 %v1707_v9, %v1706_v19 }
 0x630   :  { %3140 = vtanh.f32 %v3611_v5  ;;  %v1917_v12 = vrot.slane %v3611_v5, 6 }
 0x63a   :  { %v3141_v22 = vpop.eup %3140 }
 0x63b   :  { %v3614_v23 = vmul.f32 %v3141_v22, %v3139_v21 }
 0x63d   :  { %v1736_v25 = vrot.slane %v3614_v23, 2  ;;  %v2206_v14 = vmul.f32 %v2184_v24, %v3614_v23 }
 0x63f   :  { %2757 = vmatmul.mubr.msk.f32.vlgmr.msra.gmra.mrb[20].mxu0 %vm473_vm4, %v1736_v25  ;;  %2760 = vmatmul.mubr.msk.f32.vlgmr.msra.gmra.mrb[20].mxu1 %vm473_vm4, %v1736_v25  ;;  %v2207_v26 = vsel %vm2145_vm5, %v2206_v14, 0.0 }
 0x640   :  { %2208 = vadd.xlane.f32.xlu1 %v2207_v26  ;;  %2983 = vmatpush1.bf16.msk.msra.mxu0 %vm3357_vm3, %v3394_v38 }
 0x641   :  { %2989 = vmatpush1.bf16.msk.msra.mxu1 %vm3357_vm3, %v3399_v39  ;;  %2016 = vmatprep.mubr.f32.mxu0 %v3218_v7 }
 0x642   :  { %2087 = vmatprep.mubr.f32.mxu1 %v3218_v7 }
 0x712   :  { %v1805_v35 = vpop.f32.mrb[20].mxu0  ;;  %v1876_v36 = vpop.f32.mrb[20].mxu1 }
 0x713   :  { %v1885_v42 = vrot.slane %v1805_v35, 4  ;;  %v1807_v28 = vpop.f32.mrb[21].mxu0  ;;  %v1878_v38 = vpop.f32.mrb[21].mxu1  ;;  %v1887_v52 = vrot.slane %v1876_v36, 4  ;;  %v2164_v35 = vsel %vm477_vm1, %v2163_v34, 0.0  ;;  %v2186_v36 = vmul.f32 %v2184_v24, %v3490_v10 }
 0x714   :  { %v1886_v29 = vrot.slane %v1807_v28, 4  ;;  %v1888_v56 = vrot.slane %v1878_v38, 4  ;;  %v1928_v28 = vld [vmem:[#allocation3] sm:$0x3]  ;;  %v1929_v38 = vld [vmem:[#allocation3 + $0x8] sm:$0x3] }
 0x715   :  { %v1893_v39 = vadd.f32 %v1885_v42, %v1731_v37  ;;  %v1895_v57 = vadd.f32 %v1887_v52, %v1733_v54  ;;  %v3193_v37 = vld [vmem:[%s3838_s7] sm:$0x3]  ;;  %v1936_v45 = vrot.slane %v1928_v28, 2 }
 0x716   :  { %v1894_v47 = vadd.f32 %v1886_v29, %v1732_v46  ;;  %v1896_v59 = vadd.f32 %v1888_v56, %v1734_v58  ;;  %v2179_v42 = vmul.f32 %v3193_v37, %v3462_v15  ;;  %v1937_v46 = vrot.slane %v1929_v38, 2  ;;  %v1924_v29 = vld [vmem:[#allocation2 + $0x20] sm:$0xc0]  ;;  %v1931_v58 = vld [vmem:[#allocation3 + $0x18] sm:$0x3] }
 0x717   :  { %v2761_v33 = vmul.f32 -1.442695, %v1893_v39  ;;  %v2763_v60 = vmul.f32 -1.442695, %v1895_v57 }
 0x718   :  { %v2762_v51 = vmul.f32 -1.442695, %v1894_v47  ;;  %v2180_v44 = vsel %vm477_vm1, %v2179_v42, 0.0  ;;  %v1944_v47 = vadd.f32 %v1936_v45, %v1924_v29  ;;  %v1945_v52 = vadd.f32 %v1937_v46, %v1925_v48  ;;  %v2140_v48 = vpop.xlane.xlu0 %2139 }
 0x719   :  { %3142 = vpow2.f32 %v2761_v33 }
 0x71a   :  { %3144 = vpow2.f32 %v2762_v51  ;;  %v1930_v51 = vld [vmem:[#allocation3 + $0x10] sm:$0x3] }
 0x71b   :  { %3146 = vtanh.f32 %v1896_v59  ;;  %v1938_v57 = vrot.slane %v1930_v51, 2  ;;  %v1926_v59 = vld [vmem:[#allocation2 + $0x30] sm:$0xc0] }
 0x71c   :  { %3148 = vpow2.f32 %v2763_v60 }
 0x723   :  { %v3143_v61 = vpop.eup %3142 }
 0x724   :  { %v1906_v62 = vadd.f32 1.0, %v3143_v61  ;;  %v3145_v63 = vpop.eup %3144 }
 0x725   :  { %v1907_v0 = vadd.f32 1.0, %v3145_v63  ;;  %v3147_v1 = vpop.eup %3146  ;;  %v1946_v63 = vadd.f32 %v1938_v57, %v1926_v59 }
 0x726   :  { %3150 = vrcp.f32 %v1906_v62  ;;  %v3149_v3 = vpop.eup %3148  ;;  %v1939_v62 = vrot.slane %v1931_v58, 2 }
 0x727   :  { %3152 = vrcp.f32 %v1907_v0  ;;  %v1908_v21 = vadd.f32 1.0, %v3149_v3  ;;  %v1927_v0 = vld [vmem:[#allocation2 + $0x38] sm:$0xc0] }
 0x729   :  { %3154 = vrcp.f32 %v1908_v21 }
 0x730   :  { %v3151_v9 = vpop.eup %3150 }
 0x731   :  { %v1920_v18 = vmul.f32 %v3151_v9, %v3147_v1  ;;  %v3153_v19 = vpop.eup %3152  ;;  %v1947_v9 = vadd.f32 %v1939_v62, %v1927_v0 }
 0x732   :  { %v1919_v22 = vmul.f32 %v3153_v19, %v1917_v12 }
 0x733   :  { %v3155_v14 = vpop.eup %3154 }
 0x734   :  { %v3633_v25 = vadd.f32 %v1920_v18, %v1919_v22 }
 0x736   :  { %3156 = vtanh.f32 %v3633_v25 }
 0x740   :  { %v3157_v26 = vpop.eup %3156 }
 0x741   :  { %v3636_v27 = vmul.f32 %v3157_v26, %v3155_v14 }
 0x743   :  { %v1949_v30 = vrot.slane %v3636_v27, 4  ;;  %v2210_v31 = vmul.f32 %v2190_v4, %v3636_v27  ;;  %v2187_v4 = vsel %vm2145_vm5, %v2186_v36, 0.0  ;;  %v2171_v46 = vmul.f32 %v2149_v6, %v3636_v27  ;;  %v2486_v6 = vld [vmem:[%s3841_s10 + $0x8] sm:$0xff] }
 0x745   :  { %2766 = vmatmul.mubr.msk.f32.vlgmr.msra.gmra.mrb[22].mxu0 %vm473_vm4, %v1949_v30  ;;  %2769 = vmatmul.mubr.msk.f32.vlgmr.msra.gmra.mrb[22].mxu1 %vm473_vm4, %v1949_v30  ;;  %v2211_v5 = vsel %vm2152_vm6, %v2210_v31, 0.0  ;;  %v2172_v29 = vsel %vm2152_vm6, %v2171_v46, 0.0 }
 0x746   :  { %2212 = vadd.xlane.f32.xlu0 %v2211_v5  ;;  %v2130_v5 = vrot.slane %v3633_v25, 6  ;;  %v2167_v25 = vmul.f32 %v2142_v8, %v3614_v23  ;;  %v2485_v8 = vld [vmem:[%s3841_s10] sm:$0xff]  ;;  %2840 = vmatprep.mubr.msk.f32.mxu0 %vm3222_vm8, %v3218_v7 }
 0x747   :  { %2875 = vmatprep.mubr.msk.f32.mxu1 %vm3222_vm8, %v3218_v7 }
 0x748   :  { %v2168_v45 = vsel %vm2145_vm5, %v2167_v25, 0.0 }
 0x74a   :  { %2165 = vadd.xlane.f32.xlu0 %v2164_v35 }
 0x74e   :  { %2188 = vadd.xlane.f32.xlu0 %v2187_v4 }
 0x752   :  { %2181 = vadd.xlane.f32.xlu0 %v2180_v44 }
 0x818   :  { %v2018_v39 = vpop.f32.mrb[22].mxu0  ;;  %v2089_v24 = vpop.f32.mrb[22].mxu1 }
 0x819   :  { %v2098_v33 = vrot.slane %v2018_v39, 2  ;;  %v2020_v49 = vpop.f32.mrb[23].mxu0  ;;  %v2091_v50 = vpop.f32.mrb[23].mxu1  ;;  %v2100_v61 = vrot.slane %v2089_v24, 2  ;;  %v3220_v39 = vmov 0   ;;  %v2991_v24 = vpack.c.bf16 %v2486_v6, %v2485_v8 }
 0x81a   :  { %v2099_v53 = vrot.slane %v2020_v49, 2  ;;  %v2101_v1 = vrot.slane %v2091_v50, 2  ;;  %3045 = vset.pattern.permute.xlu1 %v3220_v39  ;;  %3044 = vset.pattern.permute.xlu0 %v3220_v39  ;;  %v2148_v49 = vpop.xlane.xlu0 %2147  ;;  %v2155_v50 = vpop.xlane.xlu1 %2154 }
 0x81b   :  { %v2106_v54 = vadd.f32 %v2098_v33, %v1944_v47  ;;  %v2108_v3 = vadd.f32 %v2100_v61, %v1946_v63  ;;  %v2470_v47 = vld [vmem:[%s3840_s9 + $0x8] sm:$0xff] }
 0x81c   :  { %v2107_v55 = vadd.f32 %v2099_v53, %v1945_v52  ;;  %v2109_v12 = vadd.f32 %v2101_v1, %v1947_v9  ;;  %v3015_v33 = vpack.c.bf16 %v2470_v47, %v2469_v40 }
 0x81d   :  { %v2770_v56 = vmul.f32 -1.442695, %v2106_v54  ;;  %v2772_v18 = vmul.f32 -1.442695, %v2108_v3 }
 0x81e   :  { %v2771_v60 = vmul.f32 -1.442695, %v2107_v55  ;;  %v2195_v51 = vpop.xlane.xlu0 %2194  ;;  %v2162_v52 = vpop.xlane.xlu1 %2161 }
 0x81f   :  { %3158 = vpow2.f32 %v2770_v56 }
 0x820   :  { %3160 = vpow2.f32 %v2771_v60 }
 0x821   :  { %3162 = vtanh.f32 %v2109_v12 }
 0x822   :  { %3164 = vpow2.f32 %v2772_v18  ;;  %v2205_v53 = vpop.xlane.xlu0 %2204  ;;  %v2201_v54 = vpop.xlane.xlu1 %2200 }
 0x823   :  { %v2231_v60 = vrot.slane %v2205_v53, 2 }
 0x825   :  { %v2233_v3 = vadd.f32 %v2231_v60, %v2162_v52 }
 0x826   :  { %v2213_v55 = vpop.xlane.xlu0 %2212  ;;  %v2209_v56 = vpop.xlane.xlu1 %2208 }
 0x827   :  { %v2223_v57 = vrot.slane %v2213_v55, 2  ;;  %v2227_v59 = vrot.slane %v2209_v56, 6 }
 0x829   :  { %v3159_v19 = vpop.eup %3158  ;;  %v2225_v61 = vadd.f32 %v2223_v57, %v2148_v49  ;;  %v2229_v63 = vadd.f32 %v2227_v59, %v2155_v50 }
 0x82a   :  { %v2119_v21 = vadd.f32 1.0, %v3159_v19  ;;  %v3161_v22 = vpop.eup %3160  ;;  %v2166_v58 = vpop.xlane.xlu0 %2165  ;;  %v2239_v19 = vrot.slane %v2195_v51, 2 }
 0x82b   :  { %v2120_v14 = vadd.f32 1.0, %v3161_v22  ;;  %v3163_v26 = vpop.eup %3162  ;;  %v2251_v9 = vrot.slane %v2225_v61, 2 }
 0x82c   :  { %3166 = vrcp.f32 %v2119_v21  ;;  %v3165_v30 = vpop.eup %3164  ;;  %v2255_v21 = vrot.slane %v2229_v63, 4 }
 0x82d   :  { %3168 = vrcp.f32 %v2120_v14  ;;  %v2121_v35 = vadd.f32 1.0, %v3165_v30  ;;  %v2235_v14 = vrot.slane %v2201_v54, 6 }
 0x82e   :  { %v2189_v1 = vpop.xlane.xlu0 %2188 }
 0x82f   :  { %3170 = vrcp.f32 %v2121_v35  ;;  %v2243_v30 = vrot.slane %v2189_v1, 6  ;;  %v2237_v35 = vadd.f32 %v2235_v14, %v2166_v58 }
 0x836   :  { %v3167_v31 = vpop.eup %3166 }
 0x837   :  { %v2133_v32 = vmul.f32 %v3167_v31, %v3163_v26  ;;  %v3169_v34 = vpop.eup %3168  ;;  %v2259_v26 = vrot.slane %v2233_v3, 6 }
 0x838   :  { %v2132_v36 = vmul.f32 %v3169_v34, %v2130_v5 }
 0x839   :  { %v3171_v37 = vpop.eup %3170 }
 0x83a   :  { %v2134_v4 = vadd.f32 %v2133_v32, %v2132_v36  ;;  %v2182_v32 = vpop.xlane.xlu0 %2181 }
 0x83c   :  { %3172 = vtanh.f32 %v2134_v4 }
 0x846   :  { %v3173_v42 = vpop.eup %3172 }
 0x847   :  { %v3660_v44 = vmul.f32 %v3173_v42, %v3171_v37  ;;  %v2247_v37 = vrot.slane %v2182_v32, 2 }
 0x849   :  { %v2214_v28 = vmul.f32 %v2196_v17, %v3660_v44  ;;  %v2175_v41 = vmul.f32 %v2156_v13, %v3660_v44  ;;  %v3221_v13 = vmov 0.0|0.0  }
 0x84a   :  { %2990 = vmatprep.subr.bf16.mxu0 %v3221_v13  ;;  %3014 = vmatprep.subr.bf16.mxu1 %v3221_v13 }
 0x84b   :  { %v2215_v38 = vsel %vm2159_vm7, %v2214_v28, 0.0  ;;  %v2176_v17 = vsel %vm2159_vm7, %v2175_v41, 0.0  ;;  %2992 = vmatpush3.bf16.msra.mxu0 %v2991_v24  ;;  %3016 = vmatpush3.bf16.msra.mxu1 %v3015_v33 }
 0x84c   :  { %2216 = vadd.xlane.f32.xlu1 %v2215_v38  ;;  %2993 = vmatprep.subr.bf16.mxu0 %v3221_v13 }
 0x84d   :  { %3017 = vmatprep.subr.bf16.mxu1 %v3221_v13 }
 0x850   :  { %2169 = vadd.xlane.f32.xlu1 %v2168_v45 }
 0x854   :  { %2173 = vadd.xlane.f32.xlu1 %v2172_v29 }
 0x858   :  { %2177 = vadd.xlane.f32.xlu1 %v2176_v17 }
 0x8d9   :  { %v2217_v62 = vpop.xlane.xlu1 %2216 }
 0x8da   :  { %v2219_v0 = vrot.slane %v2217_v62, 6 }
 0x8dc   :  { %v2221_v12 = vadd.f32 %v2219_v0, %v2140_v48 }
 0x8dd   :  { %v2170_v18 = vpop.xlane.xlu1 %2169 }
 0x8de   :  { %v2253_v22 = vmax.f32 %v2221_v12, %v2251_v9  ;;  %v2241_v5 = vadd.f32 %v2239_v19, %v2170_v18 }
 0x8e0   :  { %v2257_v31 = vmax.f32 %v2253_v22, %v2255_v21  ;;  %v2264_v28 = vrot.slane %v2241_v5, 2 }
 0x8e1   :  { %v2174_v34 = vpop.xlane.xlu1 %2173 }
 0x8e2   :  { %v2261_v36 = vmax.f32 %v2257_v31, %v2259_v26  ;;  %v2245_v4 = vadd.f32 %v2243_v30, %v2174_v34 }
 0x8e4   :  { %v2262_v42 = vmax.f32 %v2261_v36, %v2237_v35  ;;  %v2268_v45 = vrot.slane %v2245_v4, 4 }
 0x8e5   :  { %v2178_v38 = vpop.xlane.xlu1 %2177 }
 0x8e6   :  { %v2266_v25 = vmax.f32 %v2262_v42, %v2264_v28  ;;  %v2249_v46 = vadd.f32 %v2247_v37, %v2178_v38 }
 0x8e8   :  { %v2270_v29 = vmax.f32 %v2266_v25, %v2268_v45  ;;  %v2272_v41 = vrot.slane %v2249_v46, 6 }
 0x8ea   :  { %v2274_v17 = vmax.f32 %v2270_v29, %v2272_v41  ;;  %v2488_v29 = vld [vmem:[%s3841_s10 + $0x18] sm:$0xff]  ;;  %v2471_v41 = vld [vmem:[%s3840_s9 + $0x10] sm:$0xff] }
 0x8ec   :  { %v2279_v39 = vrot.slane %v2274_v17, 6  ;;  %v2284_v8 = vrot.slane %v2274_v17, 4  ;;  %v2289_v6 = vrot.slane %v2274_v17, 2  ;;  %v2275_v40 = vsub.f32 %v2221_v12, %v2274_v17 }
 0x8ed   :  { %v2294_v53 = vsub.f32 %v2237_v35, %v2274_v17 }
 0x8ee   :  { %v2281_v24 = vsub.f32 %v2225_v61, %v2279_v39  ;;  %v2286_v47 = vsub.f32 %v2229_v63, %v2284_v8  ;;  %v2291_v33 = vsub.f32 %v2233_v3, %v2289_v6  ;;  %v2276_v48 = vmul.f32 1.442695, %v2275_v40 }
 0x8ef   :  { %v2297_v52 = vsub.f32 %v2241_v5, %v2279_v39  ;;  %v2300_v54 = vsub.f32 %v2245_v4, %v2284_v8  ;;  %v2303_v56 = vsub.f32 %v2249_v46, %v2289_v6  ;;  %v2295_v57 = vmul.f32 1.442695, %v2294_v53  ;;  %v2487_v46 = vld [vmem:[%s3841_s10 + $0x10] sm:$0xff]  ;;  %v2472_v39 = vld [vmem:[%s3840_s9 + $0x18] sm:$0xff]  ;;  %v2489_v8 = vld [vmem:[%s3841_s10 + $0x20] sm:$0xff] }
 0x8f0   :  { %v2282_v49 = vmul.f32 1.442695, %v2281_v24  ;;  %v2287_v50 = vmul.f32 1.442695, %v2286_v47  ;;  %v2292_v51 = vmul.f32 1.442695, %v2291_v33  ;;  %3174 = vpow2.f32 %v2276_v48 }
 0x8f1   :  { %v2298_v55 = vmul.f32 1.442695, %v2297_v52  ;;  %v2301_v58 = vmul.f32 1.442695, %v2300_v54  ;;  %v2304_v59 = vmul.f32 1.442695, %v2303_v56  ;;  %v2994_v17 = vpack.c.bf16 %v2488_v29, %v2487_v46 }
 0x8f2   :  { %3176 = vpow2.f32 %v2282_v49  ;;  %v2490_v6 = vld [vmem:[%s3841_s10 + $0x28] sm:$0xff]  ;;  %v3018_v40 = vpack.c.bf16 %v2472_v39, %v2471_v41  ;;  %v2473_v24 = vld [vmem:[%s3840_s9 + $0x20] sm:$0xff]  ;;  %v2475_v52 = vld [vmem:[%s3840_s9 + $0x30] sm:$0xff]  ;;  %v2384_v46 = vrot.slane %v3614_v23, 6  ;;  %v2354_v29 = vrot.slane %v3660_v44, 6 }
 0x8f3   :  { %3178 = vpow2.f32 %v2287_v50  ;;  %v2474_v47 = vld [vmem:[%s3840_s9 + $0x28] sm:$0xff]  ;;  %2995 = vmatpush3.bf16.msra.mxu0 %v2994_v17  ;;  %v2997_v33 = vpack.c.bf16 %v2490_v6, %v2489_v8  ;;  %v2491_v50 = vld [vmem:[%s3841_s10 + $0x30] sm:$0xff]  ;;  %v2476_v54 = vld [vmem:[%s3840_s9 + $0x38] sm:$0xff]  ;;  %v2401_v8 = vrot.slane %v3587_v20, 2 }
 0x8f4   :  { %3180 = vpow2.f32 %v2292_v51  ;;  %3019 = vmatpush3.bf16.msra.mxu1 %v3018_v40  ;;  %2996 = vmatprep.subr.bf16.mxu0 %v3221_v13  ;;  %v3021_v49 = vpack.c.bf16 %v2474_v47, %v2473_v24  ;;  %v2492_v51 = vld [vmem:[%s3841_s10 + $0x38] sm:$0xff]  ;;  %v3024_v56 = vpack.c.bf16 %v2476_v54, %v2475_v52  ;;  %v2428_v52 = vrot.slane %v3519_v11, 2 }
 0x8f5   :  { %3182 = vpow2.f32 %v2298_v55  ;;  %3020 = vmatprep.subr.bf16.mxu1 %v3221_v13  ;;  %v3000_v53 = vpack.c.bf16 %v2492_v51, %v2491_v50 }
 0x8f6   :  { %3184 = vpow2.f32 %v2295_v57  ;;  %v2493_v57 = vld [vmem:[%s3841_s10 + $0x40] sm:$0xff] }
 0x8f7   :  { %3186 = vpow2.f32 %v2301_v58  ;;  %2998 = vmatpush3.bf16.msra.mxu0 %v2997_v33  ;;  %v2494_v58 = vld [vmem:[%s3841_s10 + $0x48] sm:$0xff] }
 0x8f8   :  { %3188 = vpow2.f32 %v2304_v59  ;;  %3022 = vmatpush3.bf16.msra.mxu1 %v3021_v49  ;;  %2999 = vmatprep.subr.bf16.mxu0 %v3221_v13  ;;  %v2477_v59 = vld [vmem:[%s3840_s9 + $0x40] sm:$0xff] }
 0x8f9   :  { %3023 = vmatprep.subr.bf16.mxu1 %v3221_v13 }
 0x8fa   :  { %v3175_v60 = vpop.eup %3174 }
 0x8fb   :  { %3001 = vmatpush3.bf16.msra.mxu0 %v3000_v53 }
 0x8fc   :  { %v3177_v61 = vpop.eup %3176  ;;  %3025 = vmatpush3.bf16.msra.mxu1 %v3024_v56  ;;  %3002 = vmatprep.subr.bf16.mxu0 %v3221_v13 }
 0x8fd   :  { %v3179_v62 = vpop.eup %3178  ;;  %v2307_v63 = vrot.slane %v3177_v61, 2  ;;  %3026 = vmatprep.subr.bf16.mxu1 %v3221_v13 }
 0x8fe   :  { %v3181_v0 = vpop.eup %3180  ;;  %v2311_v3 = vrot.slane %v3179_v62, 4 }
 0x8ff   :  { %v2309_v1 = vadd.f32 %v3175_v60, %v2307_v63  ;;  %v2315_v9 = vrot.slane %v3181_v0, 6  ;;  %v3183_v18 = vpop.eup %3182 }
 0x900   :  { %v3185_v19 = vpop.eup %3184  ;;  %v2320_v14 = vrot.slane %v3183_v18, 2 }
 0x901   :  { %v2313_v12 = vadd.f32 %v2311_v3, %v2309_v1  ;;  %v3187_v22 = vpop.eup %3186  ;;  %v2496_v1 = vld [vmem:[%s3841_s10 + $0x58] sm:$0xff]  ;;  %v2479_v3 = vld [vmem:[%s3840_s9 + $0x50] sm:$0xff] }
 0x902   :  { %v3694_v30 = vpop.eup %3188  ;;  %v2324_v31 = vrot.slane %v3187_v22, 4 }
 0x903   :  { %v2317_v21 = vadd.f32 %v2315_v9, %v2313_v12  ;;  %v2328_v32 = vrot.slane %v3694_v30, 6  ;;  %v2480_v12 = vld [vmem:[%s3840_s9 + $0x58] sm:$0xff] }
 0x905   :  { %v2318_v26 = vadd.f32 %v3185_v19, %v2317_v21  ;;  %v2497_v21 = vld [vmem:[%s3841_s10 + $0x60] sm:$0xff] }
 0x907   :  { %v2322_v5 = vadd.f32 %v2320_v14, %v2318_v26  ;;  %v2481_v14 = vld [vmem:[%s3840_s9 + $0x60] sm:$0xff] }
 0x909   :  { %v2326_v34 = vadd.f32 %v2324_v31, %v2322_v5  ;;  %v2499_v5 = vld [vmem:[%s3841_s10 + $0x70] sm:$0xff] }
 0x90b   :  { %v2330_v35 = vadd.f32 %v2328_v32, %v2326_v34  ;;  %v2500_v32 = vld [vmem:[%s3841_s10 + $0x78] sm:$0xff]  ;;  %v2483_v34 = vld [vmem:[%s3840_s9 + $0x70] sm:$0xff] }
 0x90d   :  { %3190 = vrcp.f32 %v2330_v35  ;;  %v3012_v35 = vpack.c.bf16 %v2500_v32, %v2499_v5 }
 0x917   :  { %v3191_v36 = vpop.eup %3190 }
 0x918   :  { %v2332_v4 = vmul.f32 %v3191_v36, %v3175_v60  ;;  %v2334_v37 = vrot.slane %v3191_v36, 6  ;;  %v2343_v28 = vmul.f32 %v3191_v36, %v3185_v19  ;;  %v2337_v38 = vrot.slane %v3191_v36, 4 }
 0x919   :  { %v2340_v45 = vrot.slane %v3191_v36, 2  ;;  %v3003_v60 = vpack.c.bf16 %v2494_v58, %v2493_v57  ;;  %v3030_v19 = vpack.c.bf16 %v2480_v12, %v2479_v3  ;;  %v2484_v36 = vld [vmem:[%s3840_s9 + $0x78] sm:$0xff] }
 0x91a   :  { %2349 = vperm.xlu1 %3045, %v2332_v4   ;;  %v2336_v42 = vmul.f32 %v3177_v61, %v2334_v37  ;;  %v2339_v25 = vmul.f32 %v3179_v62, %v2337_v38  ;;  %v2344_v55 = vmul.f32 %v3183_v18, %v2334_v37  ;;  %v2478_v61 = vld [vmem:[%s3840_s9 + $0x48] sm:$0xff]  ;;  %v2345_v62 = vmul.f32 %v3187_v22, %v2337_v38 }
 0x91b   :  { %v2342_v48 = vmul.f32 %v3181_v0, %v2340_v45  ;;  %v3027_v63 = vpack.c.bf16 %v2478_v61, %v2477_v59  ;;  %v2495_v0 = vld [vmem:[%s3841_s10 + $0x50] sm:$0xff]  ;;  %3004 = vmatpush3.bf16.msra.mxu0 %v3003_v60  ;;  %v2346_v18 = vmul.f32 %v3694_v30, %v2340_v45  ;;  %v2498_v22 = vld [vmem:[%s3841_s10 + $0x68] sm:$0xff]  ;;  %v3036_v4 = vpack.c.bf16 %v2484_v36, %v2483_v34 }
 0x91c   :  { %2359 = vperm.xlu0 %3044, %v2336_v42   ;;  %v3006_v9 = vpack.c.bf16 %v2496_v1, %v2495_v0  ;;  %3005 = vmatprep.subr.bf16.mxu0 %v3221_v13  ;;  %v3009_v26 = vpack.c.bf16 %v2498_v22, %v2497_v21  ;;  %v2482_v30 = vld [vmem:[%s3840_s9 + $0x68] sm:$0xff]  ;;  %v2445_v0 = vrot.slane %v3490_v10, 6  ;;  %v2462_v22 = vrot.slane %v3462_v15, 2 }
 0x91d   :  { %3028 = vmatpush3.bf16.msra.mxu1 %v3027_v63  ;;  %v3033_v31 = vpack.c.bf16 %v2482_v30, %v2481_v14 }
 0x91e   :  { %2410 = vperm.xlu1 %3045, %v2343_v28   ;;  %3029 = vmatprep.subr.bf16.mxu1 %v3221_v13  ;;  %v2367_v28 = vrot.slane %v3636_v27, 2 }
 0x91f   :  { %3007 = vmatpush3.bf16.msra.mxu0 %v3006_v9 }
 0x920   :  { %3008 = vmatprep.subr.bf16.mxu0 %v3221_v13 }
 0x921   :  { %3031 = vmatpush3.bf16.msra.mxu1 %v3030_v19 }
 0x922   :  { %2376 = vperm.xlu1 %3045, %v2339_v25   ;;  %3032 = vmatprep.subr.bf16.mxu1 %v3221_v13 }
 0x923   :  { %3010 = vmatpush3.bf16.msra.mxu0 %v3009_v26 }
 0x924   :  { %3011 = vmatprep.subr.bf16.mxu0 %v3221_v13 }
 0x925   :  { %3034 = vmatpush3.bf16.msra.mxu1 %v3033_v31 }
 0x926   :  { %2393 = vperm.xlu1 %3045, %v2342_v48   ;;  %3035 = vmatprep.subr.bf16.mxu1 %v3221_v13 }
 0x927   :  { %3013 = vmatpush3.bf16.msra.mxu0 %v3012_v35 }
 0x929   :  { %3037 = vmatpush3.bf16.msra.mxu1 %v3036_v4 }
 0x92a   :  { %2420 = vperm.xlu1 %3045, %v2344_v55  }
 0x92e   :  { %2437 = vperm.xlu1 %3045, %v2345_v62  }
 0x932   :  { %2454 = vperm.xlu1 %3045, %v2346_v18  }
 0x999   :  { %v2350_v37 = vpop.permute.xlu1 %2349 }
 0x99a   :  { %v2352_v6 = vmul.f32 %v2350_v37, %v3462_v15  ;;  %v2356_v40 = vmul.f32 %v2354_v29, %v2350_v37  ;;  %v2773_v15 = vld [vmem:[%s3842_s11] ss:$0 sm:$0xff]  ;;  %s3223_s11 = smov [#allocation4]  }
 0x99b   :  { %v2360_v42 = vpop.permute.xlu0 %2359  ;;  %s2681_s5 = sshll.u32 %s3223_s11, 4  ;;  %s2682_s5 = int_to_ptr.vmem [resolvable:$true] %s2681_s5 }
 0x99c   :  { %v2362_v25 = vmul.f32 %v2360_v42, %v3490_v10  ;;  %v2369_v45 = vmul.f32 %v2367_v28, %v2360_v42  ;;  %v2655_v28 = vand.u32 127, %v56_v43  ;;  %s3194_s22 = scalar_lea.vmem %s2682_s5, 32  ;;  %p3199_p1 = scmp.lt.s32.totalorder %s2682_s5, %s2682_s5 }
 0x99d   :  { %v2411_v38 = vpop.permute.xlu1 %2410  ;;  %p3195_p0 = scmp.ne.s32.totalorder %s2682_s5, %s3194_s22  ;;  %p3200_p2 = scmp.lt.s32.totalorder %s3194_s22, %s3194_s22 }
 0x99e   :  { %v2364_v17 = vrot.slane %v2362_v25, 2  ;;  %v2371_v39 = vrot.slane %v2369_v45, 2  ;;  %v2413_v62 = vmul.f32 %v2411_v38, %v3587_v20  ;;  %v2416_v63 = vmul.f32 %v2411_v38, %v3555_v2 }
 0x99f   :  { %p3201_p3 = por %p3200_p2, %p3199_p1 }
 0x9a0   :  { %v2366_v48 = vadd.f32 %v2364_v17, %v2352_v6  ;;  %v2373_v49 = vadd.f32 %v2371_v39, %v2356_v40 }
 0x9a1   :  { %v2377_v41 = vpop.permute.xlu1 %2376  ;;  %p3202_p4 = pnand %p3201_p3, %p3195_p0 }
 0x9a2   :  { %v2379_v13 = vmul.f32 %v2377_v41, %v3519_v11  ;;  %v2386_v7 = vmul.f32 %v2384_v46, %v2377_v41 }
 0x9a4   :  { %v2381_v24 = vrot.slane %v2379_v13, 4  ;;  %v2388_v47 = vrot.slane %v2386_v7, 4 }
 0x9a5   :  { %v2394_v33 = vpop.permute.xlu1 %2393 }
 0x9a6   :  { %v2396_v50 = vmul.f32 %v2394_v33, %v3551_v16  ;;  %v2403_v51 = vmul.f32 %v2401_v8, %v2394_v33  ;;  %v2383_v53 = vadd.f32 %v2381_v24, %v2366_v48  ;;  %v2390_v54 = vadd.f32 %v2388_v47, %v2373_v49 }
 0x9a8   :  { %v2398_v55 = vrot.slane %v2396_v50, 6  ;;  %v2405_v56 = vrot.slane %v2403_v51, 6 }
 0x9a9   :  { %v2421_v57 = vpop.permute.xlu1 %2420 }
 0x9aa   :  { %v2400_v58 = vadd.f32 %v2398_v55, %v2383_v53  ;;  %v2407_v59 = vadd.f32 %v2405_v56, %v2390_v54  ;;  %v2423_v60 = vmul.f32 %v2421_v57, %v3614_v23  ;;  %v2430_v61 = vmul.f32 %v2428_v52, %v2421_v57 }
 0x9ac   :  { %v2414_v16 = vadd.f32 %v2413_v62, %v2400_v58  ;;  %v2417_v1 = vadd.f32 %v2416_v63, %v2407_v59  ;;  %v2425_v11 = vrot.slane %v2423_v60, 2  ;;  %v2432_v9 = vrot.slane %v2430_v61, 2 }
 0x9ad   :  { %v2438_v3 = vpop.permute.xlu1 %2437 }
 0x9ae   :  { %v2440_v12 = vmul.f32 %v2438_v3, %v3636_v27  ;;  %v2447_v18 = vmul.f32 %v2445_v0, %v2438_v3  ;;  %v2427_v14 = vadd.f32 %v2425_v11, %v2414_v16  ;;  %v2434_v26 = vadd.f32 %v2432_v9, %v2417_v1 }
 0x9b0   :  { %v2442_v19 = vrot.slane %v2440_v12, 4  ;;  %v2449_v21 = vrot.slane %v2447_v18, 4 }
 0x9b1   :  { %v2455_v23 = vpop.permute.xlu1 %2454 }
 0x9b2   :  { %v2457_v20 = vmul.f32 %v2455_v23, %v3660_v44  ;;  %v2464_v2 = vmul.f32 %v2462_v22, %v2455_v23  ;;  %v2444_v30 = vadd.f32 %v2442_v19, %v2427_v14  ;;  %v2451_v10 = vadd.f32 %v2449_v21, %v2434_v26 }
 0x9b4   :  { %v2459_v31 = vrot.slane %v2457_v20, 6  ;;  %v2466_v5 = vrot.slane %v2464_v2, 6 }
 0x9b6   :  { %v2461_v32 = vadd.f32 %v2459_v31, %v2444_v30  ;;  %v2468_v34 = vadd.f32 %v2466_v5, %v2451_v10 }
 0x9b8   :  { %2841 = vmatmul.mubr.f32.vlgmr.msra.gmra.mrb[24].mxu0 %v2468_v34  ;;  %2876 = vmatmul.mubr.f32.vlgmr.msra.gmra.mrb[24].mxu1 %v2461_v32 }
 0xa8b   :  { %v2567_v27 = vpop.f32.mrb[24].mxu0  ;;  %v2637_v35 = vpop.f32.mrb[24].mxu1 }
 0xa8c   :  { %v2638_v36 = vadd.f32 %v2637_v35, %v2567_v27  ;;  %v2842_v4 = vpop.f32.mrb[25].mxu0  ;;  %v2877_v37 = vpop.f32.mrb[25].mxu1 }
 0xa8e   :  { %v2648_v44 = vadd.f32 %v2773_v15, %v2638_v36 }
 0xa90   :  { %v2651_v42 = vsel %vm2649_vm9, %v2648_v44, -inf  ;;  %2650 = vst.msk [vmem:[#allocation4] sm:$0x3] %vm2649_vm9, %v2648_v44 }
 0xa91   :  { %2652 = vmax.xlane.f32.xlu1 %v2651_v42 }
 0xb1e   :  { %v2653_v38 = vpop.xlane.xlu1 %2652 }
 0xb1f   :  { %vm2656_vm10 = vcmp.eq.f32.partialorder %v2648_v44, %v2653_v38 }
 0xb20   :  { %v2657_v25 = vsel %vm2656_vm10, %v2655_v28, 4 }
 0xb21   :  { %v2658_v45 = vsel %vm2649_vm9, %v2657_v25, 2147483647 }
 0xb22   :  { %v2660_v46 = vshra.s32 %v2658_v45, 16  ;;  %v2659_v41 = vand.u32 65535, %v2658_v45 }
 0xb24   :  { %v2662_v29 = vcvt.s32.f32 %v2660_v46  ;;  %v2661_v39 = vcvt.s32.f32 %v2659_v41 }
 0xb26   :  { %2663 = vmin.xlane.f32.xlu0 %v2662_v29 }
 0xbb3   :  { %v2664_v17 = vpop.xlane.xlu0 %2663 }
 0xbb4   :  { %vm2665_vm11 = vcmp.eq.f32.partialorder %v2662_v29, %v2664_v17 }
 0xbb5   :  { %v2666_v13 = vsel %vm2665_vm11, %v2661_v39, inf }
 0xbb6   :  { %2667 = vmin.xlane.f32.xlu0 %v2666_v13 }
 0xbb7   :  { %3205 = shalt.err (!%p3202_p4)
}
 0xbb8   :  { %s3206_s25 = scalar_lea.hbm %s3843_s12, 32 }
 0xbb9   :  { %p3207_p5 = scmp.ne.s32.totalorder %s3843_s12, %s3206_s25  ;;  %p3210_p6 = scmp.lt.u32.totalorder %s3206_s25, %s3843_s12 }
 0xbbb   :  { %p3212_p7 = pnand %p3210_p6, %p3207_p5 }
 0xbbd   :  { %3215 = shalt.err (!%p3212_p7)
}
 0xbbe   :  { %2684 = dma.vmem_to_hbm [thread:$0]  %s2682_s5, 32, %s3843_s12, [#allocation5]   ;;  %v2670_v43 = vcvt.f32.s32 %v2664_v17  ;;  %vm2673_vm12 = vcmask 1024  }
 0xbc0   :  { %v2671_v8 = vshll.u32 %v2670_v43, 16 }
 0xc43   :  { %v2668_v7 = vpop.xlane.xlu0 %2667 }
 0xc44   :  { %v2669_v6 = vcvt.f32.s32 %v2668_v7 }
 0xc46   :  { %v2672_v40 = vadd.s32 %v2671_v8, %v2669_v6 }
 0xc48   :  { %2674 = vst.msk [vmem:[%s3844_s13] sm:$0x3] %vm2673_vm12, %v2672_v40 }
 0xc49   :  { %3216 = dma.done.wait [#allocation5], 32  }
 0xc4a   :  { %3217 = vsyncadd [#allocation5], 4294967264 }
 0xc4b   :  { %2692 = vsyncpa [#allocation5], 1 }

</bundles_post_ra>
